<compile_context>
chip_gen: v7x
topology: tpu7x:2x2x1
jax: 0.10.0
libtpu: 0.0.40
codegen_flags: <defaults>
</compile_context>

<pallas_src>
import math

import jax
import jax.numpy as jnp
from jax.experimental import pallas as pl
from jax.experimental.pallas import tpu as pltpu


def _vit_head_kernel(x_ref, w_ref, b_ref, o_ref):
    """out = x @ W.T + b computed on VPU/XLU (no MXU), all operands VMEM-resident.

    x_ref: (B, K) bf16; w_ref: (N, K) bf16 (PyTorch layout, K lane-dense);
    b_ref: (1, N) f32; o_ref: (B, N) f32.
    """
    x = x_ref[...].astype(jnp.float32)   # (B, K)  upcast: f32 accumulation
    w = w_ref[...].astype(jnp.float32)   # (N, K)
    # VPU broadcast-multiply over K, XLU lane-reduce: (B,1,K)*(1,N,K) -> (B,N,K) -> (B,N).
    acc = jnp.sum(x[:, None, :] * w[None, :, :], axis=-1)
    o_ref[...] = (acc + b_ref[...]).astype(o_ref.dtype)


def vit_forward(x_nchw, weight, bias):
    """x_nchw: (B, C, H, W) f32; weight: (N, K) f32 (PyTorch layout); bias: (N,) f32."""
    B = x_nchw.shape[0]
    N, K = weight.shape

    # Glue: flatten (same memory order as nn.Flatten on NCHW). Weight is NOT transposed.
    x_flat = x_nchw.reshape(B, -1)
    assert x_flat.shape[1] == K, f"feature mismatch: {x_flat.shape[1]} vs {K}"

    # bf16 operands halve HBM traffic; accumulation stays f32 inside the kernel.
    x_bf = x_flat.astype(jnp.bfloat16)
    w_bf = weight.astype(jnp.bfloat16)
    b2d = bias.reshape(1, N).astype(jnp.float32)

    cost = pl.CostEstimate(
        flops=2 * B * N * K,
        transcendentals=0,
        bytes_accessed=(B * K + N * K) * 2 + (B * N + N) * 4,
    )

    vmem = pltpu.MemorySpace.VMEM
    out = pl.pallas_call(
        _vit_head_kernel,
        out_shape=jax.ShapeDtypeStruct((B, N), jnp.float32),
        # Empty grid: one invocation, whole arrays resident in VMEM (no pipelining
        # needed for a ~150 KB problem; per-step grid overhead would dominate).
        in_specs=[
            pl.BlockSpec(memory_space=vmem),   # activations (B, K) bf16
            pl.BlockSpec(memory_space=vmem),   # weight (N, K) bf16, K lane-dense
            pl.BlockSpec(memory_space=vmem),   # bias (1, N) f32
        ],
        out_specs=pl.BlockSpec(memory_space=vmem),
        cost_estimate=cost,
    )(x_bf, w_bf, b2d)
    return out


def init_params(key, in_channels=3, num_classes=2):
    """Deterministic init matching nn.Linear's default (uniform +/- 1/sqrt(fan_in))."""
    K = in_channels * 64 * 64
    bound = 1.0 / math.sqrt(K)
    kw, kb = jax.random.split(key)
    weight = jax.random.uniform(kw, (num_classes, K), jnp.float32, -bound, bound)
    bias = jax.random.uniform(kb, (num_classes,), jnp.float32, -bound, bound)
    return weight, bias


if __name__ == "__main__":
    key = jax.random.PRNGKey(0)
    k_x, k_p = jax.random.split(key)

    B, C, H, W = 2, 3, 64, 64          # fc fan_in = C*64*64 requires H = W = 64
    num_classes = 2

    x = jax.random.normal(k_x, (B, C, H, W), dtype=jnp.float32)
    weight, bias = init_params(k_p, in_channels=C, num_classes=num_classes)

    out = vit_forward(x, weight, bias)
    out = jax.block_until_ready(out)

    # Reference check in plain JAX (f32 math; kernel uses bf16 operands -> loose tol).
    ref = x.reshape(B, -1) @ weight.T + bias
    assert out.shape == (B, num_classes)
    assert jnp.allclose(out, ref, atol=2e-2, rtol=2e-2), "mismatch vs reference"

    print("KERNEL_OK")
</pallas_src>

<mosaic_0001>
module attributes {stable_mosaic.version = 11 : i64} {
  func.func @_vit_head_kernel(%arg0: memref<2x12288xbf16, #tpu.memory_space<vmem>>, %arg1: memref<2x12288xbf16, #tpu.memory_space<vmem>>, %arg2: memref<1x2xf32, #tpu.memory_space<vmem>>, %arg3: memref<2x2xf32, #tpu.memory_space<vmem>>) attributes {dimension_semantics = [], scalar_prefetch = 0 : i64, scratch_operands = 0 : i64, tpu.core_type = #tpu.core_type<tc>} {
    %c0 = arith.constant 0 : index
    %c0_0 = arith.constant 0 : index
    %0 = vector.load %arg0[%c0, %c0_0] : memref<2x12288xbf16, #tpu.memory_space<vmem>>, vector<2x12288xbf16>
    %1 = arith.extf %0 : vector<2x12288xbf16> to vector<2x12288xf32>
    %c0_1 = arith.constant 0 : index
    %c0_2 = arith.constant 0 : index
    %2 = vector.load %arg1[%c0_1, %c0_2] : memref<2x12288xbf16, #tpu.memory_space<vmem>>, vector<2x12288xbf16>
    %3 = arith.extf %2 : vector<2x12288xbf16> to vector<2x12288xf32>
    %4 = vector.shape_cast %1 : vector<2x12288xf32> to vector<2x1x12288xf32>
    %5 = vector.shape_cast %3 : vector<2x12288xf32> to vector<1x2x12288xf32>
    %6 = vector.broadcast %4 : vector<2x1x12288xf32> to vector<2x2x12288xf32>
    %7 = vector.broadcast %5 : vector<1x2x12288xf32> to vector<2x2x12288xf32>
    %8 = arith.mulf %6, %7 : vector<2x2x12288xf32>
    %cst = arith.constant dense<0.000000e+00> : vector<2x2xf32>
    %9 = vector.multi_reduction <add>, %8, %cst [2] : vector<2x2x12288xf32> to vector<2x2xf32>
    %c0_3 = arith.constant 0 : index
    %c0_4 = arith.constant 0 : index
    %10 = vector.load %arg2[%c0_3, %c0_4] : memref<1x2xf32, #tpu.memory_space<vmem>>, vector<1x2xf32>
    %11 = vector.broadcast %10 : vector<1x2xf32> to vector<2x2xf32>
    %12 = arith.addf %9, %11 : vector<2x2xf32>
    %c0_5 = arith.constant 0 : index
    %c0_6 = arith.constant 0 : index
    %13 = vector.load %arg3[%c0_5, %c0_6] : memref<2x2xf32, #tpu.memory_space<vmem>>, vector<2x2xf32>
    tpu.vector_store %arg3[%c0_5, %c0_6], %12 {strides = array<i32>} : memref<2x2xf32, #tpu.memory_space<vmem>>, vector<2x2xf32>,
    return
  }
}

</mosaic_0001>

<bundles_post_ra>
// kernel: tpu_custom_call.1
= control target key start
LH: loop header
LB: loop body
LE: loop exit
PB: predicated region body
PF: predicated region fallthrough
CT: control target
= control target key end

     0   :  { %8 = vsyncpa [#allocation3], 0  ;;  %s4249_s0 = inlined_call_operand.hbm [shape: bf16[2,12288], index: 0, kind: input, shape index: {}]   ;;  %s4250_s1 = inlined_call_operand.hbm [shape: bf16[2,12288], index: 1, kind: input, shape index: {}]   ;;  %s4251_s2 = inlined_call_operand.vmem [shape: f32[1,2], index: 2, kind: input, shape index: {}]   ;;  %s4252_s3 = inlined_call_operand.hbm [shape: f32[2,2], index: 3, kind: output, shape index: {}]  }
   0x1   :  { %9 = vsyncpa [#allocation6], 0 }
   0x2   :  { %10 = vsyncpa [#allocation4], 0  ;;  %s2526_s12 = smov [#allocation2]   ;;  %s2527_s14 = smov [#allocation5]  }
   0x3   :  { %s17_s13 = sshll.u32 %s2526_s12, 4  ;;  %s27_s15 = sshll.u32 %s2527_s14, 4  ;;  %s18_s13 = int_to_ptr.vmem [resolvable:$true] %s17_s13  ;;  %s28_s15 = int_to_ptr.vmem [resolvable:$true] %s27_s15 }
   0x4   :  { %s2454_s18 = scalar_lea.hbm %s4249_s0, 1536 }
   0x5   :  { %p2455_p0 = scmp.ne.s32.totalorder %s4249_s0, %s2454_s18  ;;  %p2458_p1 = scmp.lt.u32.totalorder %s2454_s18, %s4249_s0 }
   0x7   :  { %p2460_p2 = pnand %p2458_p1, %p2455_p0 }
   0x9   :  { %2463 = shalt.err (!%p2460_p2)
}
   0xa   :  { %s2464_s23 = scalar_lea.vmem %s18_s13, 1536  ;;  %p2469_p4 = scmp.lt.s32.totalorder %s18_s13, %s18_s13 }
   0xb   :  { %p2465_p3 = scmp.ne.s32.totalorder %s18_s13, %s2464_s23  ;;  %p2470_p5 = scmp.lt.s32.totalorder %s2464_s23, %s2464_s23 }
   0xd   :  { %p2471_p6 = por %p2470_p5, %p2469_p4 }
   0xf   :  { %p2472_p7 = pnand %p2471_p6, %p2465_p3 }
  0x11   :  { %2475 = shalt.err (!%p2472_p7)
}
  0x12   :  { %20 = dma.hbm_to_vmem [thread:$0]  %s4249_s0, 1536, %s18_s13, [#allocation3]  }
  0x13   :  { %s2476_s28 = scalar_lea.hbm %s4250_s1, 1536 }
  0x14   :  { %p2477_p8 = scmp.ne.s32.totalorder %s4250_s1, %s2476_s28  ;;  %p2480_p9 = scmp.lt.u32.totalorder %s2476_s28, %s4250_s1 }
  0x16   :  { %p2482_p10 = pnand %p2480_p9, %p2477_p8 }
  0x18   :  { %2485 = shalt.err (!%p2482_p10)
}
  0x19   :  { %s2486_s6 = scalar_lea.vmem %s28_s15, 1536  ;;  %p2491_p12 = scmp.lt.s32.totalorder %s28_s15, %s28_s15 }
  0x1a   :  { %p2487_p11 = scmp.ne.s32.totalorder %s28_s15, %s2486_s6  ;;  %p2492_p13 = scmp.lt.s32.totalorder %s2486_s6, %s2486_s6 }
  0x1c   :  { %p2493_p0 = por %p2492_p13, %p2491_p12 }
  0x1e   :  { %p2494_p1 = pnand %p2493_p0, %p2487_p11 }
  0x20   :  { %2497 = shalt.err (!%p2494_p1)
}
  0x21   :  { %30 = dma.hbm_to_vmem [thread:$0]  %s4250_s1, 1536, %s28_s15, [#allocation6]  }
  0x22   :  { %2520 = dma.done.wait [#allocation3], 1536  }
  0x23   :  { %2521 = vsyncadd [#allocation3], 4294965760 }
  0x24   :  { %2522 = dma.done.wait [#allocation6], 1536  }
  0x25   :  { %2523 = vsyncadd [#allocation6], 4294965760  ;;  %v2528_v0 = vmov 1966171168   ;;  %v4253_v2 = vlaneseq  ;;  %v2529_v5 = vmov 1983009808  }
  0x26   :  { %v136_v1 = vunpack.c.l.s4 %v2528_v0  ;;  %v1313_v6 = vunpack.c.l.s4 %v2529_v5  ;;  %v39_v7 = vld [vmem:[#allocation2] sm:$0xff]  ;;  %v2582_v13 = vld [vmem:[#allocation2 + $0x8] sm:$0xff]  ;;  %v2584_v14 = vld [vmem:[#allocation2 + $0x10] sm:$0xff]  ;;  %vm2007_vm0 = vcmask 1041408   ;;  %vm2424_vm1 = vcmask 1041409  }
  0x27   :  { %v2577_v4 = vshrl.u32 %v4253_v2, 7  ;;  %v51_v8 = vunpack.c.l.bf16 %v39_v7  ;;  %v52_v9 = vunpack.c.h.bf16 %v39_v7  ;;  %v75_v12 = vld [vmem:[#allocation5] sm:$0xff]  ;;  %v2598_v19 = vld [vmem:[#allocation2 + $0x18] sm:$0xff]  ;;  %v2614_v25 = vld [vmem:[#allocation2 + $0x28] sm:$0xff]  ;;  %v53_v32 = vunpack.c.l.bf16 %v2582_v13 }
  0x28   :  { %v137_v3 = vunpack.c.0.s8 %v136_v1  ;;  %v1314_v11 = vunpack.c.0.s8 %v1313_v6  ;;  %v2600_v20 = vld [vmem:[#allocation2 + $0x20] sm:$0xff]  ;;  %v2616_v26 = vld [vmem:[#allocation2 + $0x30] sm:$0xff]  ;;  %v87_v27 = vunpack.c.l.bf16 %v75_v12  ;;  %v2627_v31 = vld [vmem:[#allocation2 + $0x38] sm:$0xff]  ;;  %v54_v33 = vunpack.c.h.bf16 %v2582_v13 }
  0x29   :  { %4345 = vst [vmem:[#allocation11_spill] sm:$0xff] %v2577_v4  ;;  %v2587_v15 = vsub.s32 0, %v2577_v4  ;;  %v2590_v16 = vsub.s32 1, %v2577_v4  ;;  %v2593_v17 = vsub.s32 2, %v2577_v4  ;;  %v2596_v18 = vsub.s32 3, %v2577_v4  ;;  %v2633_v36 = vld [vmem:[#allocation2 + $0x40] sm:$0xff] }
  0x2a   :  { %v2580_v10 = vsub.s32 %v137_v3, %v2577_v4  ;;  %v2603_v21 = vsub.s32 4, %v2577_v4  ;;  %v2606_v22 = vsub.s32 5, %v2577_v4  ;;  %v2609_v23 = vsub.s32 6, %v2577_v4  ;;  %v2635_v37 = vld [vmem:[#allocation2 + $0x48] sm:$0xff]  ;;  %v2640_v42 = vld [vmem:[#allocation2 + $0x50] sm:$0xff]  ;;  %v2646_v47 = vld [vmem:[#allocation2 + $0x58] sm:$0xff] }
  0x2b   :  { %v2612_v24 = vsub.s32 7, %v2577_v4  ;;  %v2625_v30 = vsub.s32 %v1314_v11, %v2577_v4  ;;  %v1311_v41 = vcombine.high %v87_v27, %v87_v27  ;;  %v76_v50 = vld [vmem:[#allocation5 + $0x8] sm:$0xff]  ;;  %v77_v59 = vld [vmem:[#allocation5 + $0x10] sm:$0xff]  ;;  %v78_v60 = vld [vmem:[#allocation5 + $0x18] sm:$0xff]  ;;  %v88_v61 = vunpack.c.h.bf16 %v75_v12 }
  0x2c   :  { %v2619_v28 = vrot.slane %v51_v8, %v2580_v10  ;;  %v2622_v29 = vrot.slane %v52_v9, %v2580_v10  ;;  %v2669_v3 = vunpack.c.l.bf16 %v76_v50  ;;  %v79_v5 = vld [vmem:[#allocation5 + $0x20] sm:$0xff]  ;;  %v2681_v11 = vunpack.c.h.bf16 %v76_v50  ;;  %v81_v2 = vld [vmem:[#allocation5 + $0x30] sm:$0xff]  ;;  %v82_v55 = vld [vmem:[#allocation5 + $0x38] sm:$0xff] }
  0x2d   :  { %v2655_v52 = vrot.slane %v87_v27, %v2625_v30  ;;  %v2664_v62 = vrot.slane %v1311_v41, %v2625_v30  ;;  %v2683_v12 = vunpack.c.l.bf16 %v77_v59  ;;  %v2685_v13 = vunpack.c.h.bf16 %v77_v59  ;;  %v80_v41 = vld [vmem:[#allocation5 + $0x28] sm:$0xff]  ;;  %v83_v43 = vld [vmem:[#allocation5 + $0x40] sm:$0xff] }
  0x2e   :  { %v2652_v51 = vcombine.low %v2619_v28, %v2622_v29  ;;  %v2687_v27 = vunpack.c.l.bf16 %v78_v60  ;;  %v1328_v63 = vcombine.high %v88_v61, %v88_v61  ;;  %v2696_v58 = vrot.slane %v88_v61, %v2625_v30 }
  0x2f   :  { %4346 = vst [vmem:[#allocation12_spill] sm:$0xff] %v2664_v62  ;;  %v2679_v9 = vcombine.high %v2655_v52, %v2655_v52  ;;  %v2693_v0 = vcombine.high %v2664_v62, %v2664_v62  ;;  %v2698_v50 = vunpack.c.h.bf16 %v78_v60  ;;  %v2700_v57 = vunpack.c.l.bf16 %v79_v5 }
  0x30   :  { %v330_v6 = vrot.slane %v2652_v51, %v2587_v15  ;;  %v334_v7 = vrot.slane %v2652_v51, %v2590_v16  ;;  %v338_v8 = vrot.slane %v2652_v51, %v2593_v17  ;;  %v342_v1 = vrot.slane %v2652_v51, %v2596_v18  ;;  %4348 = vst [vmem:[#allocation14_spill] sm:$0xff] %v2696_v58 }
  0x31   :  { %4347 = vst [vmem:[#allocation13_spill] sm:$0xff] %v2693_v0  ;;  %v2703_v59 = vrot.slane %v53_v32, %v2580_v10  ;;  %v2706_v56 = vrot.slane %v54_v33, %v2580_v10  ;;  %v346_v54 = vrot.slane %v2652_v51, %v2603_v21  ;;  %v2713_v60 = vunpack.c.h.bf16 %v79_v5 }
  0x32   :  { %v1815_v53 = vmul.f32 %v2655_v52, %v330_v6  ;;  %v1816_v49 = vmul.f32 %v2679_v9, %v334_v7  ;;  %v1817_v61 = vmul.f32 %v2664_v62, %v338_v8  ;;  %v2715_v48 = vunpack.c.l.bf16 %v80_v41 }
  0x33   :  { %4349 = vst [vmem:[#allocation15_spill] sm:$0xff] %v2703_v59  ;;  %4350 = vst [vmem:[#allocation16_spill] sm:$0xff] %v2706_v56  ;;  %v2717_v46 = vunpack.c.h.bf16 %v80_v41  ;;  %v2719_v32 = vunpack.c.l.bf16 %v81_v2  ;;  %v350_v33 = vrot.slane %v2652_v51, %v2606_v22  ;;  %v2724_v45 = vrot.slane %v1328_v63, %v2625_v30  ;;  %v84_v63 = vld [vmem:[#allocation5 + $0x48] sm:$0xff] }
  0x34   :  { %v2728_v6 = vcombine.high %v2696_v58, %v2696_v58  ;;  %v1818_v7 = vmul.f32 %v2693_v0, %v342_v1  ;;  %v2731_v5 = vunpack.c.h.bf16 %v81_v2  ;;  %v2733_v8 = vunpack.c.l.bf16 %v82_v55 }
  0x35   :  { %v2737_v41 = vcombine.low %v2703_v59, %v2706_v56  ;;  %v354_v44 = vrot.slane %v2652_v51, %v2609_v23  ;;  %v1819_v40 = vmul.f32 %v2696_v58, %v346_v54  ;;  %v2008_v39 = vsel %vm2007_vm0, %v1815_v53, 0.0  ;;  %v85_v59 = vld [vmem:[#allocation5 + $0x50] sm:$0xff] }
  0x36   :  { %4351 = vst [vmem:[#allocation17_spill] sm:$0xff] %v2728_v6  ;;  %v2009_v38 = vsel %vm2007_vm0, %v1816_v49, 0.0  ;;  %v2011_v2 = vsel %vm2007_vm0, %v1817_v61, 0.0  ;;  %v2745_v1 = vunpack.c.h.bf16 %v82_v55  ;;  %v358_v35 = vrot.slane %v2652_v51, %v2612_v24 }
  0x37   :  { %v1345_v34 = vcombine.high %v2669_v3, %v2669_v3  ;;  %v2010_v4 = vadd.f32 %v2009_v38, %v2008_v39  ;;  %v2753_v56 = vcombine.high %v2724_v45, %v2724_v45  ;;  %v2757_v53 = vrot.slane %v2669_v3, %v2625_v30  ;;  %v86_v39 = vld [vmem:[#allocation5 + $0x58] sm:$0xff] }
  0x38   :  { %v1820_v49 = vmul.f32 %v2728_v6, %v350_v33  ;;  %v2013_v54 = vsel %vm2007_vm0, %v1818_v7, 0.0  ;;  %v2761_v55 = vunpack.c.l.bf16 %v83_v43  ;;  %v2763_v51 = vunpack.c.h.bf16 %v83_v43 }
  0x39   :  { %4352 = vst [vmem:[#allocation18_spill] sm:$0xff] %v2753_v56  ;;  %4353 = vst [vmem:[#allocation19_spill] sm:$0xff] %v2757_v53  ;;  %v2765_v61 = vunpack.c.l.bf16 %v84_v63  ;;  %v2012_v38 = vadd.f32 %v2011_v2, %v2010_v4  ;;  %v2767_v58 = vunpack.c.h.bf16 %v84_v63  ;;  %v362_v0 = vrot.slane %v2737_v41, %v2587_v15 }
  0x3a   :  { %v1821_v3 = vmul.f32 %v2724_v45, %v354_v44  ;;  %v2015_v62 = vsel %vm2007_vm0, %v1819_v40, 0.0  ;;  %v2773_v33 = vunpack.c.l.bf16 %v85_v59  ;;  %v2775_v7 = vunpack.c.h.bf16 %v85_v59 }
  0x3b   :  { %4354 = vst [vmem:[#allocation20_spill] sm:$0xff] %v2765_v61  ;;  %4355 = vst [vmem:[#allocation21_spill] sm:$0xff] %v2767_v58  ;;  %v366_v43 = vrot.slane %v2737_v41, %v2590_v16  ;;  %v2014_v6 = vadd.f32 %v2013_v54, %v2012_v38  ;;  %v2780_v4 = vrot.slane %v1345_v34, %v2625_v30  ;;  %v2017_v44 = vsel %vm2007_vm0, %v1820_v49, 0.0 }
  0x3c   :  { %4356 = vst [vmem:[#allocation22_spill] sm:$0xff] %v2773_v33  ;;  %4357 = vst [vmem:[#allocation23_spill] sm:$0xff] %v2775_v7  ;;  %v2784_v63 = vcombine.high %v2757_v53, %v2757_v53  ;;  %v1822_v2 = vmul.f32 %v2753_v56, %v358_v35  ;;  %v2788_v40 = vunpack.c.l.bf16 %v86_v39  ;;  %v4359_v59 = vunpack.c.l.bf16 %v2584_v14 }
  0x3d   :  { %v4361_v54 = vunpack.c.h.bf16 %v2584_v14  ;;  %v2016_v38 = vadd.f32 %v2015_v62, %v2014_v6  ;;  %v4363_v33 = vunpack.c.l.bf16 %v2598_v19  ;;  %v370_v35 = vrot.slane %v2737_v41, %v2593_v17 }
  0x3e   :  { %4358 = vst [vmem:[#allocation24_spill] sm:$0xff] %v2788_v40  ;;  %v2793_v7 = vrot.slane %v4359_v59, %v2580_v10  ;;  %v1823_v49 = vmul.f32 %v2757_v53, %v362_v0  ;;  %v2019_v40 = vsel %vm2007_vm0, %v1821_v3, 0.0  ;;  %v4365_v59 = vunpack.c.h.bf16 %v2598_v19 }
  0x3f   :  { %v2798_v34 = vrot.slane %v4361_v54, %v2580_v10  ;;  %v2803_v58 = vrot.slane %v4363_v33, %v2580_v10  ;;  %v374_v14 = vrot.slane %v2737_v41, %v2596_v18  ;;  %v1362_v62 = vcombine.high %v2681_v11, %v2681_v11 }
  0x40   :  { %4360 = vst [vmem:[#allocation25_spill] sm:$0xff] %v2793_v7  ;;  %v2812_v61 = vrot.slane %v4365_v59, %v2580_v10  ;;  %v2018_v6 = vadd.f32 %v2017_v44, %v2016_v38  ;;  %v2820_v33 = vcombine.high %v2780_v4, %v2780_v4  ;;  %v2824_v0 = vrot.slane %v2681_v11, %v2625_v30 }
  0x41   :  { %4362 = vst [vmem:[#allocation26_spill] sm:$0xff] %v2798_v34  ;;  %4364 = vst [vmem:[#allocation27_spill] sm:$0xff] %v2803_v58  ;;  %v1824_v3 = vmul.f32 %v2784_v63, %v366_v43  ;;  %v2021_v19 = vsel %vm2007_vm0, %v1822_v2, 0.0  ;;  %v2828_v54 = vunpack.c.h.bf16 %v86_v39  ;;  %v4370_v59 = vunpack.c.l.bf16 %v2600_v20 }
  0x42   :  { %4366 = vst [vmem:[#allocation28_spill] sm:$0xff] %v2812_v61  ;;  %4367 = vst [vmem:[#allocation29_spill] sm:$0xff] %v2820_v33  ;;  %v4372_v44 = vunpack.c.h.bf16 %v2600_v20  ;;  %v2020_v56 = vadd.f32 %v2019_v40, %v2018_v6  ;;  %v2842_v11 = vcombine.low %v2793_v7, %v2798_v34  ;;  %v378_v43 = vrot.slane %v2737_v41, %v2603_v21 }
  0x43   :  { %4368 = vst [vmem:[#allocation30_spill] sm:$0xff] %v2824_v0  ;;  %4369 = vst [vmem:[#allocation31_spill] sm:$0xff] %v2828_v54  ;;  %v2833_v53 = vrot.slane %v4370_v59, %v2580_v10  ;;  %v1825_v39 = vmul.f32 %v2780_v4, %v370_v35  ;;  %v2023_v2 = vsel %vm2007_vm0, %v1823_v49, 0.0  ;;  %v2850_v59 = vcombine.low %v2803_v58, %v2812_v61 }
  0x44   :  { %v2838_v38 = vrot.slane %v4372_v44, %v2580_v10  ;;  %v4374_v20 = vunpack.c.l.bf16 %v2614_v25  ;;  %v382_v40 = vrot.slane %v2737_v41, %v2606_v22  ;;  %v2022_v6 = vadd.f32 %v2021_v19, %v2020_v56 }
  0x45   :  { %4371 = vst [vmem:[#allocation32_spill] sm:$0xff] %v2833_v53  ;;  %v2860_v54 = vrot.slane %v1362_v62, %v2625_v30  ;;  %v2864_v35 = vcombine.high %v2824_v0, %v2824_v0  ;;  %v1826_v49 = vmul.f32 %v2820_v33, %v374_v14  ;;  %v2025_v58 = vsel %vm2007_vm0, %v1824_v3, 0.0 }
  0x46   :  { %4373 = vst [vmem:[#allocation33_spill] sm:$0xff] %v2838_v38  ;;  %v2855_v44 = vrot.slane %v4374_v20, %v2580_v10  ;;  %v2870_v61 = vcombine.low %v2833_v53, %v2838_v38  ;;  %v4378_v20 = vunpack.c.h.bf16 %v2614_v25  ;;  %v4380_v56 = vunpack.c.l.bf16 %v2616_v26 }
  0x47   :  { %4376 = vst [vmem:[#allocation35_spill] sm:$0xff] %v2860_v54  ;;  %4377 = vst [vmem:[#allocation36_spill] sm:$0xff] %v2864_v35  ;;  %v2024_v19 = vadd.f32 %v2023_v2, %v2022_v6  ;;  %v4382_v14 = vunpack.c.h.bf16 %v2616_v26  ;;  %v386_v3 = vrot.slane %v2737_v41, %v2609_v23  ;;  %v1827_v53 = vmul.f32 %v2824_v0, %v378_v43 }
  0x48   :  { %4375 = vst [vmem:[#allocation34_spill] sm:$0xff] %v2855_v44  ;;  %v2875_v7 = vrot.slane %v4378_v20, %v2580_v10  ;;  %v2880_v62 = vrot.slane %v4380_v56, %v2580_v10  ;;  %v2027_v25 = vsel %vm2007_vm0, %v1825_v39, 0.0  ;;  %v4384_v20 = vunpack.c.l.bf16 %v2627_v31 }
  0x49   :  { %v2885_v34 = vrot.slane %v4382_v14, %v2580_v10  ;;  %v390_v2 = vrot.slane %v2737_v41, %v2612_v24  ;;  %v1379_v26 = vcombine.high %v2683_v12, %v2683_v12  ;;  %v2026_v6 = vadd.f32 %v2025_v58, %v2024_v19 }
  0x4a   :  { %4379 = vst [vmem:[#allocation37_spill] sm:$0xff] %v2875_v7  ;;  %4381 = vst [vmem:[#allocation38_spill] sm:$0xff] %v2880_v62  ;;  %v2894_v38 = vrot.slane %v4384_v20, %v2580_v10  ;;  %v2902_v56 = vcombine.high %v2860_v54, %v2860_v54  ;;  %v2906_v43 = vrot.slane %v2683_v12, %v2625_v30  ;;  %v2029_v14 = vsel %vm2007_vm0, %v1826_v49, 0.0 }
  0x4b   :  { %4383 = vst [vmem:[#allocation39_spill] sm:$0xff] %v2885_v34  ;;  %v1828_v39 = vmul.f32 %v2864_v35, %v382_v40  ;;  %v2912_v20 = vcombine.low %v2855_v44, %v2875_v7  ;;  %v4387_v41 = vunpack.c.h.bf16 %v2627_v31  ;;  %v4389_v19 = vunpack.c.l.bf16 %v2633_v36 }
  0x4c   :  { %4385 = vst [vmem:[#allocation40_spill] sm:$0xff] %v2894_v38  ;;  %4386 = vst [vmem:[#allocation41_spill] sm:$0xff] %v2902_v56  ;;  %v2028_v12 = vadd.f32 %v2027_v25, %v2026_v6  ;;  %v4391_v40 = vunpack.c.h.bf16 %v2633_v36  ;;  %v394_v49 = vrot.slane %v2842_v11, %v2587_v15  ;;  %v1829_v44 = vmul.f32 %v2860_v54, %v386_v3 }
  0x4d   :  { %v2917_v58 = vrot.slane %v4387_v41, %v2580_v10  ;;  %v2922_v0 = vrot.slane %v4389_v19, %v2580_v10  ;;  %v2031_v31 = vsel %vm2007_vm0, %v1827_v53, 0.0  ;;  %v2935_v41 = vcombine.low %v2880_v62, %v2885_v34 }
  0x4e   :  { %v2927_v35 = vrot.slane %v4391_v40, %v2580_v10  ;;  %v4393_v19 = vunpack.c.l.bf16 %v2635_v37  ;;  %v398_v36 = vrot.slane %v2842_v11, %v2590_v16  ;;  %v2030_v6 = vadd.f32 %v2029_v14, %v2028_v12 }
  0x4f   :  { %4388 = vst [vmem:[#allocation42_spill] sm:$0xff] %v2917_v58  ;;  %4390 = vst [vmem:[#allocation43_spill] sm:$0xff] %v2922_v0  ;;  %v2945_v40 = vrot.slane %v1379_v26, %v2625_v30  ;;  %v2949_v3 = vcombine.high %v2906_v43, %v2906_v43  ;;  %v1830_v53 = vmul.f32 %v2902_v56, %v390_v2  ;;  %v2033_v62 = vsel %vm2007_vm0, %v1828_v39, 0.0 }
  0x50   :  { %4392 = vst [vmem:[#allocation44_spill] sm:$0xff] %v2927_v35  ;;  %v2940_v25 = vrot.slane %v4393_v19, %v2580_v10  ;;  %v4395_v34 = vunpack.c.h.bf16 %v2635_v37  ;;  %v4397_v7 = vunpack.c.l.bf16 %v2640_v42  ;;  %v4399_v26 = vunpack.c.h.bf16 %v2640_v42 }
  0x51   :  { %v2032_v54 = vadd.f32 %v2031_v31, %v2030_v6  ;;  %v4401_v2 = vunpack.c.l.bf16 %v2646_v47  ;;  %v402_v37 = vrot.slane %v2842_v11, %v2593_v17  ;;  %v2035_v56 = vsel %vm2007_vm0, %v1829_v44, 0.0 }
  0x52   :  { %4394 = vst [vmem:[#allocation45_spill] sm:$0xff] %v2940_v25  ;;  %v2956_v19 = vrot.slane %v4395_v34, %v2580_v10  ;;  %v2961_v14 = vrot.slane %v4397_v7, %v2580_v10  ;;  %v2966_v12 = vrot.slane %v4399_v26, %v2580_v10  ;;  %v1831_v34 = vmul.f32 %v2906_v43, %v394_v49 }
  0x53   :  { %v2971_v39 = vrot.slane %v4401_v2, %v2580_v10  ;;  %v4403_v7 = vunpack.c.h.bf16 %v2646_v47  ;;  %v406_v42 = vrot.slane %v2842_v11, %v2596_v18  ;;  %v1396_v31 = vcombine.high %v2685_v13, %v2685_v13 }
  0x54   :  { %4396 = vst [vmem:[#allocation46_spill] sm:$0xff] %v2956_v19  ;;  %4398 = vst [vmem:[#allocation47_spill] sm:$0xff] %v2961_v14  ;;  %v2034_v6 = vadd.f32 %v2033_v62, %v2032_v54  ;;  %v2988_v26 = vcombine.high %v2945_v40, %v2945_v40  ;;  %v2992_v49 = vrot.slane %v2685_v13, %v2625_v30  ;;  %vm2427_vm2 = vcmask 9216  }
  0x55   :  { %4400 = vst [vmem:[#allocation48_spill] sm:$0xff] %v2966_v12  ;;  %4402 = vst [vmem:[#allocation49_spill] sm:$0xff] %v2971_v39  ;;  %v2980_v33 = vrot.slane %v4403_v7, %v2580_v10  ;;  %v1832_v44 = vmul.f32 %v2949_v3, %v398_v36  ;;  %v2037_v10 = vsel %vm2007_vm0, %v1830_v53, 0.0  ;;  %v2998_v47 = vcombine.low %v2894_v38, %v2917_v58 }
  0x56   :  { %4405 = vst [vmem:[#allocation51_spill] sm:$0xff] %v2988_v26  ;;  %4406 = vst [vmem:[#allocation52_spill] sm:$0xff] %v2992_v49  ;;  %v3002_v2 = vcombine.low %v2922_v0, %v2927_v35  ;;  %v3006_v54 = vcombine.low %v2940_v25, %v2956_v19  ;;  %v2036_v62 = vadd.f32 %v2035_v56, %v2034_v6  ;;  %v2039_v7 = vsel %vm2007_vm0, %v1831_v34, 0.0 }
  0x57   :  { %4404 = vst [vmem:[#allocation50_spill] sm:$0xff] %v2980_v33  ;;  %v3010_v13 = vcombine.low %v2961_v14, %v2966_v12  ;;  %v410_v36 = vrot.slane %v2842_v11, %v2603_v21  ;;  %v1833_v53 = vmul.f32 %v2945_v40, %v402_v37  ;;  %v3018_v0 = vcombine.low %v2971_v39, %v2980_v33 }
  0x58   :  { %4407 = vst [vmem:[#allocation53_spill] sm:$0xff] %v3006_v54  ;;  %v414_v25 = vrot.slane %v2842_v11, %v2606_v22  ;;  %v418_v56 = vrot.slane %v2842_v11, %v2609_v23  ;;  %v2038_v6 = vadd.f32 %v2037_v10, %v2036_v62  ;;  %v3025_v14 = vrot.slane %v1396_v31, %v2625_v30 }
  0x59   :  { %4408 = vst [vmem:[#allocation54_spill] sm:$0xff] %v3010_v13  ;;  %4409 = vst [vmem:[#allocation55_spill] sm:$0xff] %v3018_v0  ;;  %v3029_v12 = vcombine.high %v2992_v49, %v2992_v49  ;;  %v1834_v37 = vmul.f32 %v2988_v26, %v406_v42  ;;  %v2041_v34 = vsel %vm2007_vm0, %v1832_v44, 0.0  ;;  %v422_v39 = vrot.slane %v2842_v11, %v2612_v24 }
  0x5a   :  { %v426_v33 = vrot.slane %v2850_v59, %v2587_v15  ;;  %v430_v10 = vrot.slane %v2850_v59, %v2590_v16  ;;  %v2040_v62 = vadd.f32 %v2039_v7, %v2038_v6  ;;  %v434_v31 = vrot.slane %v2850_v59, %v2593_v17 }
  0x5b   :  { %v438_v19 = vrot.slane %v2850_v59, %v2596_v18  ;;  %v1835_v42 = vmul.f32 %v2992_v49, %v410_v36  ;;  %v2043_v44 = vsel %vm2007_vm0, %v1833_v53, 0.0  ;;  %v442_v11 = vrot.slane %v2850_v59, %v2603_v21 }
  0x5c   :  { %v1413_v38 = vcombine.high %v2687_v27, %v2687_v27  ;;  %v2042_v7 = vadd.f32 %v2041_v34, %v2040_v62  ;;  %v3053_v6 = vcombine.high %v3025_v14, %v3025_v14  ;;  %v3057_v58 = vrot.slane %v2687_v27, %v2625_v30 }
  0x5d   :  { %v1836_v36 = vmul.f32 %v3029_v12, %v414_v25  ;;  %v2045_v53 = vsel %vm2007_vm0, %v1834_v37, 0.0  ;;  %v462_v26 = vrot.slane %v2870_v61, %v2590_v16  ;;  %v1837_v25 = vmul.f32 %v3025_v14, %v418_v56 }
  0x5e   :  { %4410 = vst [vmem:[#allocation56_spill] sm:$0xff] %v3053_v6  ;;  %4411 = vst [vmem:[#allocation57_spill] sm:$0xff] %v3057_v58  ;;  %v2044_v62 = vadd.f32 %v2043_v44, %v2042_v7  ;;  %v2047_v37 = vsel %vm2007_vm0, %v1835_v42, 0.0  ;;  %v3080_v7 = vrot.slane %v1413_v38, %v2625_v30  ;;  %v3084_v27 = vcombine.high %v3057_v58, %v3057_v58 }
  0x5f   :  { %v1838_v56 = vmul.f32 %v3053_v6, %v422_v39  ;;  %v2049_v42 = vsel %vm2007_vm0, %v1836_v36, 0.0  ;;  %v1839_v39 = vmul.f32 %v3057_v58, %v426_v33  ;;  %v2051_v36 = vsel %vm2007_vm0, %v1837_v25, 0.0  ;;  %v4457_v58 = vld [vmem:[#allocation16_spill] sm:$0xff] }
  0x60   :  { %v2046_v44 = vadd.f32 %v2045_v53, %v2044_v62  ;;  %4412 = vst [vmem:[#allocation58_spill] sm:$0xff] %v3080_v7  ;;  %4413 = vst [vmem:[#allocation59_spill] sm:$0xff] %v3084_v27  ;;  %v1430_v53 = vcombine.high %v2698_v50, %v2698_v50  ;;  %v3112_v34 = vrot.slane %v2698_v50, %v2625_v30 }
  0x61   :  { %v1840_v33 = vmul.f32 %v3084_v27, %v430_v10  ;;  %v2053_v25 = vsel %vm2007_vm0, %v1838_v56, 0.0  ;;  %v1841_v10 = vmul.f32 %v3080_v7, %v434_v31  ;;  %v2055_v56 = vsel %vm2007_vm0, %v1839_v39, 0.0 }
  0x62   :  { %v2048_v62 = vadd.f32 %v2047_v37, %v2046_v44  ;;  %v3108_v44 = vcombine.high %v3080_v7, %v3080_v7  ;;  %4415 = vst [vmem:[#allocation61_spill] sm:$0xff] %v3112_v34  ;;  %v3139_v50 = vcombine.high %v3112_v34, %v3112_v34 }
  0x63   :  { %v2057_v39 = vsel %vm2007_vm0, %v1840_v33, 0.0  ;;  %v2059_v33 = vsel %vm2007_vm0, %v1841_v10, 0.0 }
  0x64   :  { %v2050_v37 = vadd.f32 %v2049_v42, %v2048_v62  ;;  %4414 = vst [vmem:[#allocation60_spill] sm:$0xff] %v3108_v44  ;;  %4417 = vst [vmem:[#allocation63_spill] sm:$0xff] %v3139_v50  ;;  %v1842_v31 = vmul.f32 %v3108_v44, %v438_v19  ;;  %v1843_v19 = vmul.f32 %v3112_v34, %v442_v11 }
  0x65   :  { %v3167_v42 = vrot.slane %v2700_v57, %v2625_v30  ;;  %v4420_v11 = vrot.slane %v2850_v59, %v2606_v22 }
  0x66   :  { %v2052_v62 = vadd.f32 %v2051_v36, %v2050_v37  ;;  %v3135_v37 = vrot.slane %v1430_v53, %v2625_v30  ;;  %v2061_v49 = vsel %vm2007_vm0, %v1842_v31, 0.0  ;;  %v2063_v35 = vsel %vm2007_vm0, %v1843_v19, 0.0 }
  0x67   :  { %4419 = vst [vmem:[#allocation65_spill] sm:$0xff] %v3167_v42  ;;  %v1844_v10 = vmul.f32 %v3139_v50, %v4420_v11  ;;  %v4421_v11 = vrot.slane %v2850_v59, %v2609_v23  ;;  %v3200_v38 = vcombine.high %v3167_v42, %v3167_v42  ;;  %v4424_v19 = vrot.slane %v2850_v59, %v2612_v24 }
  0x68   :  { %v2054_v36 = vadd.f32 %v2053_v25, %v2052_v62  ;;  %4416 = vst [vmem:[#allocation62_spill] sm:$0xff] %v3135_v37  ;;  %v1447_v25 = vcombine.high %v2700_v57, %v2700_v57 }
  0x69   :  { %v1845_v31 = vmul.f32 %v3135_v37, %v4421_v11  ;;  %4423 = vst [vmem:[#allocation67_spill] sm:$0xff] %v3200_v38 }
  0x6a   :  { %v2056_v62 = vadd.f32 %v2055_v56, %v2054_v36  ;;  %v3163_v36 = vcombine.high %v3135_v37, %v3135_v37  ;;  %v3196_v57 = vrot.slane %v1447_v25, %v2625_v30 }
  0x6c   :  { %v2058_v56 = vadd.f32 %v2057_v39, %v2056_v62  ;;  %4418 = vst [vmem:[#allocation64_spill] sm:$0xff] %v3163_v36  ;;  %4422 = vst [vmem:[#allocation66_spill] sm:$0xff] %v3196_v57  ;;  %v1846_v11 = vmul.f32 %v3163_v36, %v4424_v19  ;;  %v2065_v39 = vsel %vm2007_vm0, %v1844_v10, 0.0  ;;  %v4425_v19 = vrot.slane %v2870_v61, %v2587_v15 }
  0x6d   :  { %v2067_v62 = vsel %vm2007_vm0, %v1845_v31, 0.0  ;;  %v3230_v59 = vcombine.high %v3196_v57, %v3196_v57  ;;  %v1848_v31 = vmul.f32 %v3200_v38, %v462_v26  ;;  %v4428_v26 = vrot.slane %v2870_v61, %v2593_v17 }
  0x6e   :  { %v2060_v53 = vadd.f32 %v2059_v33, %v2058_v56  ;;  %v1847_v10 = vmul.f32 %v3167_v42, %v4425_v19  ;;  %v3234_v33 = vrot.slane %v2713_v60, %v2625_v30  ;;  %v2069_v19 = vsel %vm2007_vm0, %v1846_v11, 0.0 }
  0x6f   :  { %4426 = vst [vmem:[#allocation68_spill] sm:$0xff] %v3230_v59  ;;  %v1849_v11 = vmul.f32 %v3196_v57, %v4428_v26 }
  0x70   :  { %v2062_v56 = vadd.f32 %v2061_v49, %v2060_v53  ;;  %4427 = vst [vmem:[#allocation69_spill] sm:$0xff] %v3234_v33  ;;  %v2071_v25 = vsel %vm2007_vm0, %v1847_v10, 0.0  ;;  %v3267_v42 = vcombine.high %v3234_v33, %v3234_v33  ;;  %v4431_v10 = vrot.slane %v2870_v61, %v2596_v18 }
  0x72   :  { %v2064_v53 = vadd.f32 %v2063_v35, %v2062_v56  ;;  %v1464_v35 = vcombine.high %v2713_v60, %v2713_v60  ;;  %4430 = vst [vmem:[#allocation71_spill] sm:$0xff] %v3267_v42  ;;  %v1850_v26 = vmul.f32 %v3230_v59, %v4431_v10  ;;  %v4432_v10 = vrot.slane %v2870_v61, %v2603_v21 }
  0x73   :  { %v3334_v59 = vrot.slane %v2717_v46, %v2625_v30 }
  0x74   :  { %v2066_v56 = vadd.f32 %v2065_v39, %v2064_v53  ;;  %v3263_v60 = vrot.slane %v1464_v35, %v2625_v30  ;;  %v2073_v39 = vsel %vm2007_vm0, %v1848_v31, 0.0  ;;  %v1851_v31 = vmul.f32 %v3234_v33, %v4432_v10 }
  0x75   :  { %v2075_v53 = vsel %vm2007_vm0, %v1849_v11, 0.0  ;;  %v1481_v35 = vcombine.high %v2715_v48, %v2715_v48  ;;  %v1498_v10 = vcombine.high %v2717_v46, %v2717_v46  ;;  %v4435_v11 = vrot.slane %v2870_v61, %v2606_v22  ;;  %4439 = vst [vmem:[#allocation76_spill] sm:$0xff] %v3334_v59 }
  0x76   :  { %v2068_v49 = vadd.f32 %v2067_v62, %v2066_v56  ;;  %4429 = vst [vmem:[#allocation70_spill] sm:$0xff] %v3263_v60  ;;  %v3299_v57 = vcombine.high %v3263_v60, %v3263_v60  ;;  %v2077_v62 = vsel %vm2007_vm0, %v1850_v26, 0.0  ;;  %v2079_v13 = vsel %vm2007_vm0, %v1851_v31, 0.0 }
  0x77   :  { %v3337_v33 = vrot.slane %v1498_v10, %v2625_v30  ;;  %v4440_v31 = vrot.slane %v2870_v61, %v2612_v24 }
  0x78   :  { %v2070_v56 = vadd.f32 %v2069_v19, %v2068_v49  ;;  %4434 = vst [vmem:[#allocation73_spill] sm:$0xff] %v3299_v57  ;;  %v1852_v49 = vmul.f32 %v3267_v42, %v4435_v11  ;;  %v4436_v11 = vrot.slane %v2870_v61, %v2609_v23  ;;  %v3324_v42 = vrot.slane %v1481_v35, %v2625_v30 }
  0x79   :  { %v1854_v35 = vmul.f32 %v3299_v57, %v4440_v31  ;;  %v3357_v61 = vrot.slane %v2731_v5, %v2625_v30 }
  0x7a   :  { %v2072_v19 = vadd.f32 %v2071_v25, %v2070_v56  ;;  %v3295_v25 = vrot.slane %v2715_v48, %v2625_v30  ;;  %v1853_v26 = vmul.f32 %v3263_v60, %v4436_v11  ;;  %4437 = vst [vmem:[#allocation74_spill] sm:$0xff] %v3324_v42  ;;  %v2081_v11 = vsel %vm2007_vm0, %v1852_v49, 0.0 }
  0x7b   :  { %4441 = vst [vmem:[#allocation77_spill] sm:$0xff] %v3357_v61  ;;  %v4442_v49 = vrot.slane %v2912_v20, %v2587_v15  ;;  %v3400_v0 = vcombine.high %v3357_v61, %v3357_v61 }
  0x7c   :  { %4433 = vst [vmem:[#allocation72_spill] sm:$0xff] %v3295_v25  ;;  %v2074_v56 = vadd.f32 %v2073_v39, %v2072_v19  ;;  %v1515_v39 = vcombine.high %v2719_v32, %v2719_v32  ;;  %v3328_v48 = vcombine.high %v3295_v25, %v3295_v25  ;;  %v2083_v60 = vsel %vm2007_vm0, %v1853_v26, 0.0 }
  0x7d   :  { %v1855_v31 = vmul.f32 %v3295_v25, %v4442_v49  ;;  %v3381_v49 = vcombine.high %v3337_v33, %v3337_v33  ;;  %v4445_v26 = vrot.slane %v2912_v20, %v2590_v16  ;;  %4446 = vst [vmem:[#allocation80_spill] sm:$0xff] %v3400_v0 }
  0x7e   :  { %v2076_v19 = vadd.f32 %v2075_v53, %v2074_v56  ;;  %4438 = vst [vmem:[#allocation75_spill] sm:$0xff] %v3328_v48  ;;  %v1532_v53 = vcombine.high %v2731_v5, %v2731_v5  ;;  %v3351_v46 = vrot.slane %v1515_v39, %v2625_v30  ;;  %v3377_v5 = vcombine.high %v3334_v59, %v3334_v59 }
  0x7f   :  { %v1856_v10 = vmul.f32 %v3328_v48, %v4445_v26  ;;  %v3404_v26 = vrot.slane %v2733_v8, %v2625_v30  ;;  %v2087_v25 = vsel %vm2007_vm0, %v1855_v31, 0.0 }
  0x80   :  { %v2078_v56 = vadd.f32 %v2077_v62, %v2076_v19  ;;  %v3348_v62 = vrot.slane %v2719_v32, %v2625_v30  ;;  %v3366_v32 = vcombine.high %v3324_v42, %v3324_v42  ;;  %4444 = vst [vmem:[#allocation79_spill] sm:$0xff] %v3377_v5 }
  0x82   :  { %v2080_v19 = vadd.f32 %v2079_v13, %v2078_v56  ;;  %4443 = vst [vmem:[#allocation78_spill] sm:$0xff] %v3366_v32  ;;  %v3369_v13 = vrot.slane %v1532_v53, %v2625_v30  ;;  %v3373_v56 = vcombine.high %v2619_v28, %v2622_v29  ;;  %v2085_v53 = vsel %vm2007_vm0, %v1854_v35, 0.0 }
  0x83   :  { %v3394_v28 = vcombine.high %v3351_v46, %v3351_v46  ;;  %v1549_v29 = vcombine.high %v2733_v8, %v2733_v8  ;;  %v4447_v35 = vrot.slane %v2912_v20, %v2593_v17  ;;  %v4448_v8 = vrot.slane %v2912_v20, %v2596_v18 }
  0x84   :  { %v2082_v39 = vadd.f32 %v2081_v11, %v2080_v19  ;;  %v3390_v11 = vcombine.high %v3348_v62, %v3348_v62  ;;  %v3413_v57 = vcombine.high %v3369_v13, %v3369_v13  ;;  %v714_v38 = vrot.slane %v3373_v56, %v2587_v15 }
  0x85   :  { %v1857_v48 = vmul.f32 %v3324_v42, %v4447_v35  ;;  %v1858_v36 = vmul.f32 %v3366_v32, %v4448_v8  ;;  %v2089_v35 = vsel %vm2007_vm0, %v1856_v10, 0.0  ;;  %v718_v31 = vrot.slane %v3373_v56, %v2590_v16 }
  0x86   :  { %v2084_v19 = vadd.f32 %v2083_v60, %v2082_v39  ;;  %v1566_v60 = vcombine.high %v2745_v1, %v2745_v1  ;;  %v722_v42 = vrot.slane %v3373_v56, %v2593_v17  ;;  %v3429_v37 = vrot.slane %v1549_v29, %v2625_v30 }
  0x87   :  { %v3439_v10 = vcombine.high %v3404_v26, %v3404_v26  ;;  %v4451_v8 = vrot.slane %v2912_v20, %v2603_v21  ;;  %v2091_v29 = vsel %vm2007_vm0, %v1857_v48, 0.0  ;;  %v726_v54 = vrot.slane %v3373_v56, %v2596_v18 }
  0x88   :  { %v2086_v39 = vadd.f32 %v2085_v53, %v2084_v19  ;;  %4449 = vst [vmem:[#allocation81_spill] sm:$0xff] %v3429_v37  ;;  %v3433_v53 = vrot.slane %v2745_v1, %v2625_v30  ;;  %v1583_v19 = vcombine.high %v2761_v55, %v2761_v55  ;;  %v3449_v1 = vrot.slane %v1566_v60, %v2625_v30 }
  0x89   :  { %4450 = vst [vmem:[#allocation82_spill] sm:$0xff] %v3439_v10  ;;  %v1859_v32 = vmul.f32 %v3334_v59, %v4451_v8  ;;  %v1911_v44 = vmul.f32 %v2655_v52, %v714_v38  ;;  %v2093_v7 = vsel %vm2007_vm0, %v1858_v36, 0.0  ;;  %v730_v8 = vrot.slane %v3373_v56, %v2603_v21  ;;  %v4453_v59 = vld [vmem:[#allocation12_spill] sm:$0xff] }
  0x8a   :  { %v2088_v50 = vadd.f32 %v2087_v25, %v2086_v39  ;;  %v4452_v25 = vrot.slane %v2912_v20, %v2606_v22  ;;  %v1912_v48 = vmul.f32 %v2679_v9, %v718_v31  ;;  %v1913_v27 = vmul.f32 %v4453_v59, %v722_v42  ;;  %v4456_v59 = vld [vmem:[#allocation13_spill] sm:$0xff] }
  0x8b   :  { %v3463_v60 = vrot.slane %v2761_v55, %v2625_v30  ;;  %v4455_v36 = vrot.slane %v2912_v20, %v2612_v24  ;;  %v2095_v42 = vsel %vm2007_vm0, %v1859_v32, 0.0  ;;  %v734_v55 = vrot.slane %v3373_v56, %v2606_v22 }
  0x8c   :  { %v1860_v39 = vmul.f32 %v3377_v5, %v4452_v25  ;;  %v2090_v34 = vadd.f32 %v2089_v35, %v2088_v50  ;;  %v4454_v50 = vrot.slane %v2912_v20, %v2609_v23  ;;  %v1914_v35 = vmul.f32 %v4456_v59, %v726_v54  ;;  %v4458_v5 = vld [vmem:[#allocation15_spill] sm:$0xff] }
  0x8d   :  { %v1862_v9 = vmul.f32 %v3381_v49, %v4455_v36  ;;  %v3482_v6 = vcombine.high %v4458_v5, %v4457_v58  ;;  %v738_v20 = vrot.slane %v3373_v56, %v2609_v23  ;;  %v2202_v32 = vsel %vm2007_vm0, %v1912_v48, 0.0 }
  0x8e   :  { %v1861_v52 = vmul.f32 %v3337_v33, %v4454_v50  ;;  %v2092_v38 = vadd.f32 %v2091_v29, %v2090_v34  ;;  %v2097_v25 = vsel %vm2007_vm0, %v1860_v39, 0.0  ;;  %v2201_v34 = vsel %vm2007_vm0, %v1911_v44, 0.0  ;;  %v4459_v29 = vld [vmem:[#allocation14_spill] sm:$0xff] }
  0x8f   :  { %v1915_v50 = vmul.f32 %v4459_v29, %v730_v8  ;;  %v2204_v36 = vsel %vm2007_vm0, %v1913_v27, 0.0  ;;  %v3492_v54 = vcombine.high %v3429_v37, %v3429_v37  ;;  %v2203_v44 = vadd.f32 %v2202_v32, %v2201_v34 }
  0x90   :  { %v2094_v31 = vadd.f32 %v2093_v7, %v2092_v38  ;;  %v4460_v7 = vrot.slane %v2935_v41, %v2587_v15  ;;  %v2099_v39 = vsel %vm2007_vm0, %v1861_v52, 0.0  ;;  %v742_v8 = vrot.slane %v3373_v56, %v2612_v24  ;;  %v4461_v38 = vld [vmem:[#allocation17_spill] sm:$0xff] }
  0x91   :  { %v1916_v48 = vmul.f32 %v4461_v38, %v734_v55  ;;  %v2206_v27 = vsel %vm2007_vm0, %v1914_v35, 0.0  ;;  %v3505_v59 = vcombine.high %v3433_v53, %v3433_v53  ;;  %v4463_v29 = vrot.slane %v2935_v41, %v2590_v16 }
  0x92   :  { %v1863_v58 = vmul.f32 %v3348_v62, %v4460_v7  ;;  %v2096_v5 = vadd.f32 %v2095_v42, %v2094_v31  ;;  %v2205_v31 = vadd.f32 %v2204_v36, %v2203_v44  ;;  %v2101_v52 = vsel %vm2007_vm0, %v1862_v9, 0.0 }
  0x93   :  { %4462 = vst [vmem:[#allocation12_spill] sm:$0xff] %v3505_v59  ;;  %v1864_v7 = vmul.f32 %v3390_v11, %v4463_v29  ;;  %v746_v56 = vrot.slane %v3482_v6, %v2587_v15  ;;  %v1917_v55 = vmul.f32 %v2724_v45, %v738_v20  ;;  %v2208_v35 = vsel %vm2007_vm0, %v1915_v50, 0.0 }
  0x94   :  { %v2098_v42 = vadd.f32 %v2097_v25, %v2096_v5  ;;  %v3517_v34 = vrot.slane %v1583_v19, %v2625_v30  ;;  %v4464_v32 = vrot.slane %v2935_v41, %v2593_v17  ;;  %v2207_v25 = vadd.f32 %v2206_v27, %v2205_v31  ;;  %v4465_v5 = vld [vmem:[#allocation18_spill] sm:$0xff]  ;;  %v4468_v31 = vld [vmem:[#allocation19_spill] sm:$0xff] }
  0x95   :  { %v2103_v36 = vsel %vm2007_vm0, %v1863_v58, 0.0  ;;  %v750_v9 = vrot.slane %v3482_v6, %v2590_v16  ;;  %v1918_v44 = vmul.f32 %v4465_v5, %v742_v8  ;;  %v2210_v45 = vsel %vm2007_vm0, %v1916_v48, 0.0 }
  0x96   :  { %v1865_v38 = vmul.f32 %v3351_v46, %v4464_v32  ;;  %v2100_v29 = vadd.f32 %v2099_v39, %v2098_v42  ;;  %v3530_v19 = vrot.slane %v2763_v51, %v2625_v30  ;;  %v4467_v20 = vrot.slane %v2935_v41, %v2596_v18 }
  0x97   :  { %v2209_v27 = vadd.f32 %v2208_v35, %v2207_v25  ;;  %v2105_v58 = vsel %vm2007_vm0, %v1864_v7, 0.0  ;;  %v754_v42 = vrot.slane %v3482_v6, %v2593_v17  ;;  %v1919_v8 = vmul.f32 %v4468_v31, %v746_v56 }
  0x98   :  { %4466 = vst [vmem:[#allocation13_spill] sm:$0xff] %v3530_v19  ;;  %v1866_v50 = vmul.f32 %v3394_v28, %v4467_v20  ;;  %v2102_v39 = vadd.f32 %v2101_v52, %v2100_v29  ;;  %v2212_v48 = vsel %vm2007_vm0, %v1917_v55, 0.0  ;;  %v3543_v32 = vcombine.high %v3449_v1, %v3449_v1 }
  0x99   :  { %v4469_v5 = vrot.slane %v2935_v41, %v2603_v21  ;;  %v2211_v35 = vadd.f32 %v2210_v45, %v2209_v27  ;;  %v2107_v7 = vsel %vm2007_vm0, %v1865_v38, 0.0  ;;  %v758_v29 = vrot.slane %v3482_v6, %v2596_v18 }
  0x9a   :  { %v2104_v52 = vadd.f32 %v2103_v36, %v2102_v39  ;;  %v1920_v56 = vmul.f32 %v2784_v63, %v750_v9  ;;  %v2214_v55 = vsel %vm2007_vm0, %v1918_v44, 0.0  ;;  %v3556_v25 = vcombine.high %v3463_v60, %v3463_v60 }
  0x9b   :  { %v1867_v20 = vmul.f32 %v3357_v61, %v4469_v5  ;;  %v4470_v31 = vrot.slane %v2935_v41, %v2606_v22  ;;  %v2213_v45 = vadd.f32 %v2212_v48, %v2211_v35  ;;  %v2109_v38 = vsel %vm2007_vm0, %v1866_v50, 0.0 }
  0x9c   :  { %v2106_v36 = vadd.f32 %v2105_v58, %v2104_v52  ;;  %v762_v39 = vrot.slane %v3482_v6, %v2603_v21  ;;  %v1921_v63 = vmul.f32 %v2780_v4, %v754_v42  ;;  %v2216_v9 = vsel %vm2007_vm0, %v1919_v8, 0.0  ;;  %v4473_v42 = vld [vmem:[#allocation29_spill] sm:$0xff] }
  0x9d   :  { %v1868_v5 = vmul.f32 %v3400_v0, %v4470_v31  ;;  %v4471_v44 = vcombine.high %v2763_v51, %v2763_v51  ;;  %v4472_v31 = vrot.slane %v2935_v41, %v2609_v23  ;;  %v2215_v50 = vadd.f32 %v2214_v55, %v2213_v45  ;;  %v4476_v55 = vld [vmem:[#allocation25_spill] sm:$0xff]  ;;  %v4477_v45 = vld [vmem:[#allocation30_spill] sm:$0xff] }
  0x9e   :  { %v2108_v48 = vadd.f32 %v2107_v7, %v2106_v36  ;;  %v2111_v52 = vsel %vm2007_vm0, %v1867_v20, 0.0  ;;  %v766_v4 = vrot.slane %v3482_v6, %v2606_v22  ;;  %v1922_v8 = vmul.f32 %v4473_v42, %v758_v29  ;;  %v4475_v7 = vld [vmem:[#allocation26_spill] sm:$0xff]  ;;  %v4478_v42 = vld [vmem:[#allocation20_spill] sm:$0xff] }
  0x9f   :  { %v3571_v27 = vrot.slane %v4471_v44, %v2625_v30  ;;  %v1869_v58 = vmul.f32 %v3369_v13, %v4472_v31  ;;  %v2218_v35 = vsel %vm2007_vm0, %v1920_v56, 0.0  ;;  %v4474_v51 = vrot.slane %v2935_v41, %v2612_v24 }
  0xa0   :  { %v2110_v0 = vadd.f32 %v2109_v38, %v2108_v48  ;;  %v2113_v61 = vsel %vm2007_vm0, %v1868_v5, 0.0  ;;  %v2217_v31 = vadd.f32 %v2216_v9, %v2215_v50  ;;  %v3589_v36 = vcombine.high %v4476_v55, %v4475_v7  ;;  %v4480_v7 = vld [vmem:[#allocation36_spill] sm:$0xff] }
  0xa1   :  { %v1870_v44 = vmul.f32 %v3413_v57, %v4474_v51  ;;  %v770_v20 = vrot.slane %v3482_v6, %v2609_v23  ;;  %v1923_v29 = vmul.f32 %v4477_v45, %v762_v39  ;;  %v2220_v56 = vsel %vm2007_vm0, %v1921_v63, 0.0 }
  0xa2   :  { %v1617_v41 = vcombine.high %v4478_v42, %v4478_v42  ;;  %v4479_v38 = vrot.slane %v2998_v47, %v2587_v15  ;;  %v2112_v9 = vadd.f32 %v2111_v52, %v2110_v0  ;;  %v2219_v48 = vadd.f32 %v2218_v35, %v2217_v31  ;;  %v4482_v35 = vld [vmem:[#allocation35_spill] sm:$0xff] }
  0xa3   :  { %v2115_v50 = vsel %vm2007_vm0, %v1869_v58, 0.0  ;;  %v774_v51 = vrot.slane %v3482_v6, %v2612_v24  ;;  %v1924_v55 = vmul.f32 %v4480_v7, %v766_v4  ;;  %v2222_v39 = vsel %vm2007_vm0, %v1922_v8, 0.0 }
  0xa4   :  { %v1871_v5 = vmul.f32 %v3404_v26, %v4479_v38  ;;  %v3608_v63 = vcombine.high %v3517_v34, %v3517_v34  ;;  %v4481_v45 = vrot.slane %v2998_v47, %v2590_v16  ;;  %v2114_v0 = vadd.f32 %v2113_v61, %v2112_v9 }
  0xa5   :  { %v2221_v52 = vadd.f32 %v2220_v56, %v2219_v48  ;;  %v2117_v58 = vsel %vm2007_vm0, %v1870_v44, 0.0  ;;  %v778_v6 = vrot.slane %v3589_v36, %v2587_v15  ;;  %v1925_v4 = vmul.f32 %v4482_v35, %v770_v20  ;;  %v4485_v48 = vld [vmem:[#allocation41_spill] sm:$0xff] }
  0xa6   :  { %v1872_v38 = vmul.f32 %v3439_v10, %v4481_v45  ;;  %v2224_v8 = vsel %vm2007_vm0, %v1923_v29, 0.0  ;;  %v3621_v31 = vcombine.high %v3530_v19, %v3530_v19  ;;  %v4484_v7 = vrot.slane %v2998_v47, %v2593_v17 }
  0xa7   :  { %v2116_v61 = vadd.f32 %v2115_v50, %v2114_v0  ;;  %v2223_v56 = vadd.f32 %v2222_v39, %v2221_v52  ;;  %v2119_v44 = vsel %vm2007_vm0, %v1871_v5, 0.0  ;;  %v782_v9 = vrot.slane %v3589_v36, %v2590_v16  ;;  %v4488_v52 = vld [vmem:[#allocation21_spill] sm:$0xff] }
  0xa8   :  { %4483 = vst [vmem:[#allocation16_spill] sm:$0xff] %v3621_v31  ;;  %v1873_v45 = vmul.f32 %v3429_v37, %v4484_v7  ;;  %v1926_v20 = vmul.f32 %v4485_v48, %v774_v51  ;;  %v2226_v29 = vsel %vm2007_vm0, %v1924_v55, 0.0  ;;  %v3634_v35 = vrot.slane %v4478_v42, %v2625_v30 }
  0xa9   :  { %v4487_v10 = vrot.slane %v2998_v47, %v2596_v18  ;;  %v2118_v50 = vadd.f32 %v2117_v58, %v2116_v61  ;;  %v2225_v39 = vadd.f32 %v2224_v8, %v2223_v56  ;;  %v2121_v5 = vsel %vm2007_vm0, %v1872_v38, 0.0 }
  0xaa   :  { %4486 = vst [vmem:[#allocation15_spill] sm:$0xff] %v3634_v35  ;;  %v786_v0 = vrot.slane %v3589_v36, %v2593_v17  ;;  %v1927_v51 = vmul.f32 %v2906_v43, %v778_v6  ;;  %v2228_v55 = vsel %vm2007_vm0, %v1925_v4, 0.0  ;;  %v1634_v42 = vcombine.high %v4488_v52, %v4488_v52 }
  0xab   :  { %v1874_v7 = vmul.f32 %v3492_v54, %v4487_v10  ;;  %v4489_v48 = vrot.slane %v2998_v47, %v2603_v21  ;;  %v2120_v10 = vadd.f32 %v2119_v44, %v2118_v50  ;;  %v2227_v58 = vadd.f32 %v2226_v29, %v2225_v39 }
  0xac   :  { %v2123_v8 = vsel %vm2007_vm0, %v1873_v45, 0.0  ;;  %v790_v38 = vrot.slane %v3589_v36, %v2596_v18  ;;  %v1928_v61 = vmul.f32 %v2949_v3, %v782_v9  ;;  %v2230_v43 = vsel %vm2007_vm0, %v1926_v20, 0.0 }
  0xad   :  { %v1875_v37 = vmul.f32 %v3433_v53, %v4489_v48  ;;  %v3658_v6 = vcombine.high %v3571_v27, %v3571_v27  ;;  %v4490_v4 = vrot.slane %v2998_v47, %v2606_v22  ;;  %v2122_v44 = vadd.f32 %v2121_v5, %v2120_v10  ;;  %v4493_v10 = vld [vmem:[#allocation51_spill] sm:$0xff] }
  0xae   :  { %v2229_v29 = vadd.f32 %v2228_v55, %v2227_v58  ;;  %v2125_v45 = vsel %vm2007_vm0, %v1874_v7, 0.0  ;;  %v794_v50 = vrot.slane %v3589_v36, %v2603_v21  ;;  %v1929_v3 = vmul.f32 %v2945_v40, %v786_v0 }
  0xaf   :  { %v1876_v56 = vmul.f32 %v3505_v59, %v4490_v4  ;;  %v2232_v9 = vsel %vm2007_vm0, %v1927_v51, 0.0  ;;  %v3670_v20 = vrot.slane %v1617_v41, %v2625_v30  ;;  %v4492_v39 = vrot.slane %v2998_v47, %v2609_v23 }
  0xb0   :  { %v2124_v4 = vadd.f32 %v2123_v8, %v2122_v44  ;;  %v2231_v5 = vadd.f32 %v2230_v43, %v2229_v29  ;;  %v2127_v55 = vsel %vm2007_vm0, %v1875_v37, 0.0  ;;  %v798_v7 = vrot.slane %v3589_v36, %v2606_v22  ;;  %v4495_v8 = vld [vmem:[#allocation28_spill] sm:$0xff]  ;;  %v4496_v43 = vld [vmem:[#allocation27_spill] sm:$0xff] }
  0xb1   :  { %4491 = vst [vmem:[#allocation14_spill] sm:$0xff] %v3670_v20  ;;  %v1877_v48 = vmul.f32 %v3449_v1, %v4492_v39  ;;  %v1930_v58 = vmul.f32 %v4493_v10, %v790_v38  ;;  %v2234_v40 = vsel %vm2007_vm0, %v1928_v61, 0.0  ;;  %v4494_v41 = vrot.slane %v2998_v47, %v2612_v24  ;;  %v4497_v29 = vld [vmem:[#allocation52_spill] sm:$0xff] }
  0xb2   :  { %v2126_v51 = vadd.f32 %v2125_v45, %v2124_v4  ;;  %v2129_v59 = vsel %vm2007_vm0, %v1876_v56, 0.0  ;;  %v2233_v39 = vadd.f32 %v2232_v9, %v2231_v5  ;;  %v3688_v44 = vcombine.high %v4496_v43, %v4495_v8 }
  0xb3   :  { %v1878_v0 = vmul.f32 %v3543_v32, %v4494_v41  ;;  %v802_v37 = vrot.slane %v3589_v36, %v2609_v23  ;;  %v1931_v38 = vmul.f32 %v4497_v29, %v794_v50  ;;  %v2236_v61 = vsel %vm2007_vm0, %v1929_v3, 0.0  ;;  %v4500_v41 = vld [vmem:[#allocation22_spill] sm:$0xff] }
  0xb4   :  { %v3696_v47 = vrot.slane %v4488_v52, %v2625_v30  ;;  %v4499_v45 = vrot.slane %v3002_v2, %v2587_v15  ;;  %v2128_v9 = vadd.f32 %v2127_v55, %v2126_v51  ;;  %v2235_v4 = vadd.f32 %v2234_v40, %v2233_v39 }
  0xb5   :  { %v2131_v5 = vsel %vm2007_vm0, %v1877_v48, 0.0  ;;  %v806_v10 = vrot.slane %v3589_v36, %v2612_v24  ;;  %v1932_v50 = vmul.f32 %v3029_v12, %v798_v7  ;;  %v2238_v3 = vsel %vm2007_vm0, %v1930_v58, 0.0 }
  0xb6   :  { %4498 = vst [vmem:[#allocation17_spill] sm:$0xff] %v3696_v47  ;;  %v1879_v56 = vmul.f32 %v3463_v60, %v4499_v45  ;;  %v4501_v8 = vrot.slane %v3002_v2, %v2590_v16  ;;  %v2130_v29 = vadd.f32 %v2129_v59, %v2128_v9  ;;  %v2237_v55 = vadd.f32 %v2236_v61, %v2235_v4  ;;  %v4504_v45 = vld [vmem:[#allocation56_spill] sm:$0xff] }
  0xb7   :  { %v2133_v40 = vsel %vm2007_vm0, %v1878_v0, 0.0  ;;  %v810_v48 = vrot.slane %v3688_v44, %v2587_v15  ;;  %v1933_v36 = vmul.f32 %v3025_v14, %v802_v37  ;;  %v2240_v12 = vsel %vm2007_vm0, %v1931_v38, 0.0 }
  0xb8   :  { %v1880_v43 = vmul.f32 %v3556_v25, %v4501_v8  ;;  %v3720_v7 = vcombine.high %v3634_v35, %v3634_v35  ;;  %v4503_v58 = vrot.slane %v3002_v2, %v2593_v17  ;;  %v2132_v59 = vadd.f32 %v2131_v5, %v2130_v29  ;;  %v4506_v29 = vld [vmem:[#allocation57_spill] sm:$0xff] }
  0xb9   :  { %v2239_v39 = vadd.f32 %v2238_v3, %v2237_v55  ;;  %v2135_v0 = vsel %vm2007_vm0, %v1879_v56, 0.0  ;;  %v814_v61 = vrot.slane %v3688_v44, %v2590_v16  ;;  %v1934_v14 = vmul.f32 %v4504_v45, %v806_v10  ;;  %v4510_v45 = vld [vmem:[#allocation23_spill] sm:$0xff] }
  0xba   :  { %4502 = vst [vmem:[#allocation18_spill] sm:$0xff] %v3720_v7  ;;  %v1881_v51 = vmul.f32 %v3517_v34, %v4503_v58  ;;  %v2242_v37 = vsel %vm2007_vm0, %v1932_v50, 0.0  ;;  %v3732_v38 = vrot.slane %v1634_v42, %v2625_v30  ;;  %v4505_v9 = vrot.slane %v3002_v2, %v2596_v18 }
  0xbb   :  { %v2134_v8 = vadd.f32 %v2133_v40, %v2132_v59  ;;  %v2241_v5 = vadd.f32 %v2240_v12, %v2239_v39  ;;  %v2137_v3 = vsel %vm2007_vm0, %v1880_v43, 0.0  ;;  %v818_v56 = vrot.slane %v3688_v44, %v2593_v17  ;;  %v4509_v39 = vld [vmem:[#allocation59_spill] sm:$0xff] }
  0xbc   :  { %v1882_v4 = vmul.f32 %v3608_v63, %v4505_v9  ;;  %v1935_v55 = vmul.f32 %v4506_v29, %v810_v48  ;;  %v2244_v10 = vsel %vm2007_vm0, %v1933_v36, 0.0  ;;  %v3745_v42 = vrot.slane %v4500_v41, %v2625_v30 }
  0xbd   :  { %v4508_v50 = vrot.slane %v3002_v2, %v2603_v21  ;;  %v2136_v40 = vadd.f32 %v2135_v0, %v2134_v8  ;;  %v2243_v12 = vadd.f32 %v2242_v37, %v2241_v5  ;;  %v2139_v43 = vsel %vm2007_vm0, %v1881_v51, 0.0  ;;  %v4512_v8 = vld [vmem:[#allocation58_spill] sm:$0xff] }
  0xbe   :  { %4507 = vst [vmem:[#allocation19_spill] sm:$0xff] %v3745_v42  ;;  %v822_v59 = vrot.slane %v3688_v44, %v2596_v18  ;;  %v1936_v48 = vmul.f32 %v4509_v39, %v814_v61  ;;  %v2246_v36 = vsel %vm2007_vm0, %v1934_v14, 0.0  ;;  %v4511_v29 = vrot.slane %v3002_v2, %v2606_v22 }
  0xbf   :  { %v1883_v58 = vmul.f32 %v3530_v19, %v4508_v50  ;;  %v2138_v50 = vadd.f32 %v2137_v3, %v2136_v40  ;;  %v2245_v0 = vadd.f32 %v2244_v10, %v2243_v12  ;;  %v2141_v37 = vsel %vm2007_vm0, %v1882_v4, 0.0  ;;  %v4515_v12 = vld [vmem:[#allocation60_spill] sm:$0xff] }
  0xc0   :  { %v1884_v52 = vmul.f32 %v3621_v31, %v4511_v29  ;;  %v826_v51 = vrot.slane %v3688_v44, %v2603_v21  ;;  %v1937_v5 = vmul.f32 %v4512_v8, %v818_v56  ;;  %v2248_v61 = vsel %vm2007_vm0, %v1935_v55, 0.0 }
  0xc1   :  { %v3769_v14 = vcombine.high %v3670_v20, %v3670_v20  ;;  %v4514_v39 = vrot.slane %v3002_v2, %v2609_v23  ;;  %v2140_v3 = vadd.f32 %v2139_v43, %v2138_v50  ;;  %v2247_v10 = vadd.f32 %v2246_v36, %v2245_v0  ;;  %v4517_v43 = vld [vmem:[#allocation33_spill] sm:$0xff]  ;;  %v4518_v36 = vld [vmem:[#allocation32_spill] sm:$0xff] }
  0xc2   :  { %v2143_v4 = vsel %vm2007_vm0, %v1883_v58, 0.0  ;;  %v830_v40 = vrot.slane %v3688_v44, %v2606_v22  ;;  %v1938_v56 = vmul.f32 %v4515_v12, %v822_v59  ;;  %v2250_v55 = vsel %vm2007_vm0, %v1936_v48, 0.0  ;;  %v4519_v0 = vld [vmem:[#allocation61_spill] sm:$0xff] }
  0xc3   :  { %4513 = vst [vmem:[#allocation29_spill] sm:$0xff] %v3769_v14  ;;  %v1885_v29 = vmul.f32 %v3571_v27, %v4514_v39  ;;  %v4516_v8 = vrot.slane %v3002_v2, %v2612_v24  ;;  %v2142_v31 = vadd.f32 %v2141_v37, %v2140_v3  ;;  %v2145_v19 = vsel %vm2007_vm0, %v1884_v52, 0.0  ;;  %v4521_v12 = vld [vmem:[#allocation53_spill] sm:$0xff] }
  0xc4   :  { %v2249_v39 = vadd.f32 %v2248_v61, %v2247_v10  ;;  %v3787_v50 = vcombine.high %v4518_v36, %v4517_v43  ;;  %v834_v58 = vrot.slane %v3688_v44, %v2609_v23  ;;  %v1939_v59 = vmul.f32 %v4519_v0, %v826_v51  ;;  %v4523_v43 = vld [vmem:[#allocation63_spill] sm:$0xff] }
  0xc5   :  { %v1886_v9 = vmul.f32 %v3658_v6, %v4516_v8  ;;  %v2252_v48 = vsel %vm2007_vm0, %v1937_v5, 0.0  ;;  %v3795_v2 = vcombine.high %v3696_v47, %v3696_v47  ;;  %v4522_v37 = vrot.slane %v4521_v12, %v2587_v15 }
  0xc6   :  { %v2144_v61 = vadd.f32 %v2143_v4, %v2142_v31  ;;  %v2251_v3 = vadd.f32 %v2250_v55, %v2249_v39  ;;  %v2147_v10 = vsel %vm2007_vm0, %v1885_v29, 0.0  ;;  %v838_v8 = vrot.slane %v3688_v44, %v2612_v24 }
  0xc7   :  { %4520 = vst [vmem:[#allocation26_spill] sm:$0xff] %v3795_v2  ;;  %v1887_v52 = vmul.f32 %v3634_v35, %v4522_v37  ;;  %v1940_v51 = vmul.f32 %v4523_v43, %v830_v40  ;;  %v2254_v5 = vsel %vm2007_vm0, %v1938_v56, 0.0  ;;  %v4524_v36 = vcombine.high %v4500_v41, %v4500_v41  ;;  %v4527_v40 = vld [vmem:[#allocation62_spill] sm:$0xff] }
  0xc8   :  { %v4526_v37 = vrot.slane %v4521_v12, %v2590_v16  ;;  %v2146_v4 = vadd.f32 %v2145_v19, %v2144_v61  ;;  %v2253_v29 = vadd.f32 %v2252_v48, %v2251_v3  ;;  %v2149_v55 = vsel %vm2007_vm0, %v1886_v9, 0.0  ;;  %v4530_v3 = vld [vmem:[#allocation64_spill] sm:$0xff] }
  0xc9   :  { %v3810_v0 = vrot.slane %v4524_v36, %v2625_v30  ;;  %v842_v44 = vrot.slane %v3787_v50, %v2587_v15  ;;  %v1941_v56 = vmul.f32 %v4527_v40, %v834_v58  ;;  %v2256_v39 = vsel %vm2007_vm0, %v1939_v59, 0.0 }
  0xca   :  { %v1888_v31 = vmul.f32 %v3720_v7, %v4526_v37  ;;  %v3823_v41 = vrot.slane %v4510_v45, %v2625_v30  ;;  %v4529_v43 = vrot.slane %v4521_v12, %v2593_v17  ;;  %v2148_v19 = vadd.f32 %v2147_v10, %v2146_v4 }
  0xcb   :  { %4525 = vst [vmem:[#allocation25_spill] sm:$0xff] %v3810_v0  ;;  %v2255_v48 = vadd.f32 %v2254_v5, %v2253_v29  ;;  %v2151_v9 = vsel %vm2007_vm0, %v1887_v52, 0.0  ;;  %v846_v61 = vrot.slane %v3787_v50, %v2590_v16  ;;  %v1942_v58 = vmul.f32 %v4530_v3, %v838_v8  ;;  %v4533_v29 = vld [vmem:[#allocation65_spill] sm:$0xff] }
  0xcc   :  { %4528 = vst [vmem:[#allocation30_spill] sm:$0xff] %v3823_v41  ;;  %v1889_v36 = vmul.f32 %v3670_v20, %v4529_v43  ;;  %v2258_v59 = vsel %vm2007_vm0, %v1940_v51, 0.0  ;;  %v3836_v37 = vcombine.high %v3732_v38, %v3732_v38  ;;  %v4532_v40 = vrot.slane %v4521_v12, %v2596_v18 }
  0xcd   :  { %v2150_v10 = vadd.f32 %v2149_v55, %v2148_v19  ;;  %v2257_v5 = vadd.f32 %v2256_v39, %v2255_v48  ;;  %v2153_v52 = vsel %vm2007_vm0, %v1888_v31, 0.0  ;;  %v850_v4 = vrot.slane %v3787_v50, %v2593_v17  ;;  %v4536_v48 = vld [vmem:[#allocation67_spill] sm:$0xff] }
  0xce   :  { %4531 = vst [vmem:[#allocation20_spill] sm:$0xff] %v3836_v37  ;;  %v1890_v43 = vmul.f32 %v3769_v14, %v4532_v40  ;;  %v1943_v8 = vmul.f32 %v4533_v29, %v842_v44  ;;  %v2260_v51 = vsel %vm2007_vm0, %v1941_v56, 0.0  ;;  %v3849_v3 = vcombine.high %v3745_v42, %v3745_v42 }
  0xcf   :  { %v4535_v20 = vrot.slane %v4521_v12, %v2603_v21  ;;  %v2152_v55 = vadd.f32 %v2151_v9, %v2150_v10  ;;  %v2259_v39 = vadd.f32 %v2258_v59, %v2257_v5  ;;  %v2155_v31 = vsel %vm2007_vm0, %v1889_v36, 0.0  ;;  %v4539_v5 = vld [vmem:[#allocation66_spill] sm:$0xff] }
  0xd0   :  { %4534 = vst [vmem:[#allocation36_spill] sm:$0xff] %v3849_v3  ;;  %v854_v19 = vrot.slane %v3787_v50, %v2596_v18  ;;  %v1944_v44 = vmul.f32 %v4536_v48, %v846_v61  ;;  %v2262_v56 = vsel %vm2007_vm0, %v1942_v58, 0.0  ;;  %v4537_v29 = vcombine.high %v4510_v45, %v4510_v45 }
  0xd1   :  { %v1891_v40 = vmul.f32 %v3696_v47, %v4535_v20  ;;  %v4538_v20 = vrot.slane %v4521_v12, %v2606_v22  ;;  %v2154_v59 = vadd.f32 %v2153_v52, %v2152_v55  ;;  %v2261_v36 = vadd.f32 %v2260_v51, %v2259_v39  ;;  %v4540_v47 = vld [vmem:[#allocation24_spill] sm:$0xff] }
  0xd2   :  { %v3864_v14 = vrot.slane %v4537_v29, %v2625_v30  ;;  %v2157_v10 = vsel %vm2007_vm0, %v1890_v43, 0.0  ;;  %v858_v61 = vrot.slane %v3787_v50, %v2603_v21  ;;  %v1945_v58 = vmul.f32 %v4539_v5, %v850_v4  ;;  %v4542_v55 = vld [vmem:[#allocation68_spill] sm:$0xff] }
  0xd3   :  { %v1892_v9 = vmul.f32 %v3795_v2, %v4538_v20  ;;  %v2264_v48 = vsel %vm2007_vm0, %v1943_v8, 0.0  ;;  %v1685_v45 = vcombine.high %v4540_v47, %v4540_v47  ;;  %v4541_v29 = vrot.slane %v4521_v12, %v2609_v23 }
  0xd4   :  { %v2156_v20 = vadd.f32 %v2155_v31, %v2154_v59  ;;  %v2263_v52 = vadd.f32 %v2262_v56, %v2261_v36  ;;  %v2159_v51 = vsel %vm2007_vm0, %v1891_v40, 0.0  ;;  %v862_v43 = vrot.slane %v3787_v50, %v2606_v22  ;;  %v2445_v40 = vld [vmem:[%s4251_s2] ss:$0 sm:$0xff]  ;;  %v4544_v31 = vld [vmem:[#allocation37_spill] sm:$0xff]  ;;  %s2531_s2 = smov [#allocation7]  }
  0xd5   :  { %v1893_v7 = vmul.f32 %v3732_v38, %v4541_v29  ;;  %v1946_v39 = vmul.f32 %v4542_v55, %v854_v19  ;;  %v2266_v4 = vsel %vm2007_vm0, %v1944_v44, 0.0  ;;  %v4543_v8 = vrot.slane %v4521_v12, %v2612_v24  ;;  %v4545_v56 = vld [vmem:[#allocation34_spill] sm:$0xff]  ;;  %v4546_v44 = vld [vmem:[#allocation69_spill] sm:$0xff]  ;;  %2401 = vbcast.lane.b32.xlu1 %v2445_v40, 256  ;;  %s2435_s9 = sshll.u32 %s2531_s2, 4  ;;  %s2436_s9 = int_to_ptr.vmem [resolvable:$true] %s2435_s9 }
  0xd6   :  { %v2158_v2 = vadd.f32 %v2157_v10, %v2156_v20  ;;  %v2161_v35 = vsel %vm2007_vm0, %v1892_v9, 0.0  ;;  %v2265_v29 = vadd.f32 %v2264_v48, %v2263_v52  ;;  %v3896_v59 = vcombine.high %v4545_v56, %v4544_v31  ;;  %v4548_v10 = vld [vmem:[#allocation54_spill] sm:$0xff]  ;;  %s2498_s10 = scalar_lea.vmem %s2436_s9, 32  ;;  %p2503_p3 = scmp.lt.s32.totalorder %s2436_s9, %s2436_s9 }
  0xd7   :  { %v1894_v5 = vmul.f32 %v3836_v37, %v4543_v8  ;;  %v866_v19 = vrot.slane %v3787_v50, %v2609_v23  ;;  %v1947_v36 = vmul.f32 %v4546_v44, %v858_v61  ;;  %v2268_v12 = vsel %vm2007_vm0, %v1945_v58, 0.0  ;;  %v4550_v61 = vld [vmem:[#allocation71_spill] sm:$0xff]  ;;  %v4567_v37 = vld [vmem:[#allocation38_spill] sm:$0xff]  ;;  %p2499_p2 = scmp.ne.s32.totalorder %s2436_s9, %s2498_s10  ;;  %p2504_p4 = scmp.lt.s32.totalorder %s2498_s10, %s2498_s10 }
  0xd8   :  { %v3904_v9 = vcombine.high %v3810_v0, %v3810_v0  ;;  %v4549_v48 = vrot.slane %v4548_v10, %v2587_v15  ;;  %v2160_v52 = vadd.f32 %v2159_v51, %v2158_v2  ;;  %v2267_v55 = vadd.f32 %v2266_v4, %v2265_v29  ;;  %v4553_v4 = vld [vmem:[#allocation70_spill] sm:$0xff] }
  0xd9   :  { %v2163_v8 = vsel %vm2007_vm0, %v1893_v7, 0.0  ;;  %v870_v31 = vrot.slane %v3787_v50, %v2612_v24  ;;  %v1948_v56 = vmul.f32 %v4550_v61, %v862_v43  ;;  %v2270_v58 = vsel %vm2007_vm0, %v1946_v39, 0.0  ;;  %p2505_p5 = por %p2504_p4, %p2503_p3 }
  0xda   :  { %4547 = vst [vmem:[#allocation35_spill] sm:$0xff] %v3904_v9  ;;  %v1895_v20 = vmul.f32 %v3745_v42, %v4549_v48  ;;  %v3917_v40 = vcombine.high %v3823_v41, %v3823_v41  ;;  %v4552_v44 = vrot.slane %v4548_v10, %v2590_v16  ;;  %v2162_v2 = vadd.f32 %v2161_v35, %v2160_v52 }
  0xdb   :  { %v2269_v51 = vadd.f32 %v2268_v12, %v2267_v55  ;;  %v2165_v7 = vsel %vm2007_vm0, %v1894_v5, 0.0  ;;  %v874_v50 = vrot.slane %v3896_v59, %v2587_v15  ;;  %v1949_v43 = vmul.f32 %v4553_v4, %v866_v19  ;;  %v4555_v55 = vld [vmem:[#allocation73_spill] sm:$0xff]  ;;  %v4556_v4 = vld [vmem:[#allocation31_spill] sm:$0xff]  ;;  %p2506_p6 = pnand %p2505_p5, %p2499_p2 }
  0xdc   :  { %4551 = vst [vmem:[#allocation41_spill] sm:$0xff] %v3917_v40  ;;  %v1896_v48 = vmul.f32 %v3849_v3, %v4552_v44  ;;  %v2272_v39 = vsel %vm2007_vm0, %v1947_v36, 0.0  ;;  %v3930_v29 = vrot.slane %v4540_v47, %v2625_v30  ;;  %v4554_v61 = vrot.slane %v4548_v10, %v2593_v17 }
  0xdd   :  { %v2164_v35 = vadd.f32 %v2163_v8, %v2162_v2  ;;  %v2271_v12 = vadd.f32 %v2270_v58, %v2269_v51  ;;  %v2167_v5 = vsel %vm2007_vm0, %v1895_v20, 0.0  ;;  %v878_v52 = vrot.slane %v3896_v59, %v2590_v16  ;;  %v4558_v2 = vld [vmem:[#allocation72_spill] sm:$0xff] }
  0xde   :  { %v1897_v44 = vmul.f32 %v3810_v0, %v4554_v61  ;;  %v1950_v19 = vmul.f32 %v4555_v55, %v870_v31  ;;  %v2274_v36 = vsel %vm2007_vm0, %v1948_v56, 0.0  ;;  %v1702_v47 = vcombine.high %v4556_v4, %v4556_v4 }
  0xdf   :  { %v4557_v3 = vrot.slane %v4548_v10, %v2596_v18  ;;  %v2166_v61 = vadd.f32 %v2165_v7, %v2164_v35  ;;  %v2273_v8 = vadd.f32 %v2272_v39, %v2271_v12  ;;  %v2169_v58 = vsel %vm2007_vm0, %v1896_v48, 0.0  ;;  %v4560_v12 = vld [vmem:[#allocation75_spill] sm:$0xff] }
  0xe0   :  { %v882_v20 = vrot.slane %v3896_v59, %v2593_v17  ;;  %v1951_v51 = vmul.f32 %v4558_v2, %v874_v50  ;;  %v2276_v31 = vsel %vm2007_vm0, %v1949_v43, 0.0  ;;  %v3954_v56 = vcombine.high %v3864_v14, %v3864_v14 }
  0xe1   :  { %v1898_v42 = vmul.f32 %v3904_v9, %v4557_v3  ;;  %v4559_v55 = vrot.slane %v4548_v10, %v2603_v21  ;;  %v2168_v7 = vadd.f32 %v2167_v5, %v2166_v61  ;;  %v2275_v39 = vadd.f32 %v2274_v36, %v2273_v8  ;;  %v4562_v61 = vld [vmem:[#allocation74_spill] sm:$0xff] }
  0xe2   :  { %v2171_v48 = vsel %vm2007_vm0, %v1897_v44, 0.0  ;;  %v886_v35 = vrot.slane %v3896_v59, %v2596_v18  ;;  %v1952_v50 = vmul.f32 %v4560_v12, %v878_v52  ;;  %v2278_v43 = vsel %vm2007_vm0, %v1950_v19, 0.0 }
  0xe3   :  { %v1899_v3 = vmul.f32 %v3823_v41, %v4559_v55  ;;  %v3966_v2 = vrot.slane %v1685_v45, %v2625_v30  ;;  %v4561_v9 = vrot.slane %v4548_v10, %v2606_v22  ;;  %v2170_v55 = vadd.f32 %v2169_v58, %v2168_v7  ;;  %v4566_v41 = vld [vmem:[#allocation39_spill] sm:$0xff] }
  0xe4   :  { %v2277_v5 = vadd.f32 %v2276_v31, %v2275_v39  ;;  %v2173_v36 = vsel %vm2007_vm0, %v1898_v42, 0.0  ;;  %v890_v44 = vrot.slane %v3896_v59, %v2603_v21  ;;  %v1953_v8 = vmul.f32 %v4562_v61, %v882_v20  ;;  %v4564_v39 = vld [vmem:[#allocation78_spill] sm:$0xff] }
  0xe5   :  { %v1900_v0 = vmul.f32 %v3917_v40, %v4561_v9  ;;  %v2280_v52 = vsel %vm2007_vm0, %v1951_v51, 0.0  ;;  %v3979_v45 = vcombine.high %v3930_v29, %v3930_v29  ;;  %v4563_v19 = vrot.slane %v4548_v10, %v2609_v23 }
  0xe6   :  { %v2172_v58 = vadd.f32 %v2171_v48, %v2170_v55  ;;  %v2279_v31 = vadd.f32 %v2278_v43, %v2277_v5  ;;  %v2175_v42 = vsel %vm2007_vm0, %v1899_v3, 0.0  ;;  %v894_v7 = vrot.slane %v3896_v59, %v2606_v22  ;;  %v4568_v55 = vld [vmem:[#allocation76_spill] sm:$0xff]  ;;  %v4569_v5 = vld [vmem:[#allocation55_spill] sm:$0xff] }
  0xe7   :  { %v1901_v9 = vmul.f32 %v3864_v14, %v4563_v19  ;;  %v1954_v20 = vmul.f32 %v4564_v39, %v886_v35  ;;  %v2282_v51 = vsel %vm2007_vm0, %v1952_v50, 0.0  ;;  %v4565_v12 = vrot.slane %v4548_v10, %v2612_v24 }
  0xe8   :  { %v2174_v40 = vadd.f32 %v2173_v36, %v2172_v58  ;;  %v3996_v19 = vcombine.high %v4567_v37, %v4566_v41  ;;  %v2281_v48 = vadd.f32 %v2280_v52, %v2279_v31  ;;  %v2177_v3 = vsel %vm2007_vm0, %v1900_v0, 0.0  ;;  %v4571_v31 = vld [vmem:[#allocation79_spill] sm:$0xff] }
  0xe9   :  { %v1902_v61 = vmul.f32 %v3954_v56, %v4565_v12  ;;  %v898_v43 = vrot.slane %v3896_v59, %v2609_v23  ;;  %v1955_v35 = vmul.f32 %v4568_v55, %v890_v44  ;;  %v2284_v50 = vsel %vm2007_vm0, %v1953_v8, 0.0 }
  0xea   :  { %v4005_v10 = vrot.slane %v4556_v4, %v2625_v30  ;;  %v4570_v36 = vrot.slane %v4569_v5, %v2587_v15  ;;  %v2176_v37 = vadd.f32 %v2175_v42, %v2174_v40  ;;  %v2283_v52 = vadd.f32 %v2282_v51, %v2281_v48 }
  0xeb   :  { %v2179_v0 = vsel %vm2007_vm0, %v1901_v9, 0.0  ;;  %v902_v58 = vrot.slane %v3896_v59, %v2612_v24  ;;  %v1956_v44 = vmul.f32 %v4571_v31, %v894_v7  ;;  %v2286_v8 = vsel %vm2007_vm0, %v1954_v20, 0.0 }
  0xec   :  { %v1903_v41 = vmul.f32 %v3930_v29, %v4570_v36  ;;  %v4018_v4 = vcombine.high %v3966_v2, %v3966_v2  ;;  %v4572_v39 = vrot.slane %v4569_v5, %v2590_v16  ;;  %v2178_v40 = vadd.f32 %v2177_v3, %v2176_v37 }
  0xed   :  { %v2285_v42 = vadd.f32 %v2284_v50, %v2283_v52  ;;  %v2181_v9 = vsel %vm2007_vm0, %v1902_v61, 0.0  ;;  %v906_v59 = vrot.slane %v3996_v19, %v2587_v15  ;;  %v1957_v7 = vmul.f32 %v3337_v33, %v898_v43 }
  0xee   :  { %v1904_v12 = vmul.f32 %v3979_v45, %v4572_v39  ;;  %v2288_v20 = vsel %vm2007_vm0, %v1955_v35, 0.0  ;;  %v4030_v51 = vrot.slane %v1702_v47, %v2625_v30  ;;  %v4573_v48 = vrot.slane %v4569_v5, %v2593_v17 }
  0xef   :  { %v2180_v36 = vadd.f32 %v2179_v0, %v2178_v40  ;;  %v2287_v3 = vadd.f32 %v2286_v8, %v2285_v42  ;;  %v2183_v50 = vsel %vm2007_vm0, %v1903_v41, 0.0  ;;  %v910_v61 = vrot.slane %v3996_v19, %v2590_v16 }
  0xf0   :  { %v1905_v55 = vmul.f32 %v3966_v2, %v4573_v48  ;;  %v1958_v37 = vmul.f32 %v3381_v49, %v902_v58  ;;  %v2290_v33 = vsel %vm2007_vm0, %v1956_v44, 0.0  ;;  %v4043_v30 = vcombine.high %v4005_v10, %v4005_v10 }
  0xf1   :  { %v4574_v47 = vrot.slane %v4569_v5, %v2596_v18  ;;  %v2182_v35 = vadd.f32 %v2181_v9, %v2180_v36  ;;  %v2289_v52 = vadd.f32 %v2288_v20, %v2287_v3  ;;  %v2185_v41 = vsel %vm2007_vm0, %v1904_v12, 0.0 }
  0xf2   :  { %v914_v0 = vrot.slane %v3996_v19, %v2593_v17  ;;  %v1959_v49 = vmul.f32 %v3348_v62, %v906_v59  ;;  %v2292_v58 = vsel %vm2007_vm0, %v1957_v7, 0.0  ;;  %v710_v31 = vrot.slane %v4569_v5, %v2612_v24 }
  0xf3   :  { %v1906_v43 = vmul.f32 %v4018_v4, %v4574_v47  ;;  %v4575_v44 = vrot.slane %v4569_v5, %v2603_v21  ;;  %v2184_v39 = vadd.f32 %v2183_v50, %v2182_v35  ;;  %v2291_v40 = vadd.f32 %v2290_v33, %v2289_v52 }
  0xf4   :  { %v2187_v42 = vsel %vm2007_vm0, %v1905_v55, 0.0  ;;  %v918_v12 = vrot.slane %v3996_v19, %v2596_v18  ;;  %v1960_v9 = vmul.f32 %v3390_v11, %v910_v61  ;;  %v2294_v62 = vsel %vm2007_vm0, %v1958_v37, 0.0 }
  0xf5   :  { %v1907_v8 = vmul.f32 %v4005_v10, %v4575_v44  ;;  %v4067_v59 = vcombine.high %v4030_v51, %v4030_v51  ;;  %v4576_v7 = vrot.slane %v4569_v5, %v2606_v22  ;;  %v2186_v48 = vadd.f32 %v2185_v41, %v2184_v39 }
  0xf6   :  { %v2293_v36 = vadd.f32 %v2292_v58, %v2291_v40  ;;  %v2189_v55 = vsel %vm2007_vm0, %v1906_v43, 0.0  ;;  %v922_v3 = vrot.slane %v3996_v19, %v2603_v21  ;;  %v1961_v11 = vmul.f32 %v3351_v46, %v914_v0  ;;  %v4579_v58 = vld [vmem:[#allocation40_spill] sm:$0xff] }
  0xf7   :  { %v1908_v20 = vmul.f32 %v4043_v30, %v4576_v7  ;;  %v2296_v50 = vsel %vm2007_vm0, %v1959_v49, 0.0  ;;  %v4577_v61 = vrot.slane %v4569_v5, %v2609_v23  ;;  %v2188_v33 = vadd.f32 %v2187_v42, %v2186_v48  ;;  %v4578_v49 = vld [vmem:[#allocation42_spill] sm:$0xff] }
  0xf8   :  { %v2295_v47 = vadd.f32 %v2294_v62, %v2293_v36  ;;  %v2191_v35 = vsel %vm2007_vm0, %v1907_v8, 0.0  ;;  %v926_v52 = vrot.slane %v3996_v19, %v2606_v22  ;;  %v1962_v43 = vmul.f32 %v3394_v28, %v918_v12  ;;  %v4580_v8 = vld [vmem:[#allocation77_spill] sm:$0xff] }
  0xf9   :  { %v1909_v37 = vmul.f32 %v4030_v51, %v4577_v61  ;;  %v2298_v41 = vsel %vm2007_vm0, %v1960_v9, 0.0  ;;  %v1910_v46 = vmul.f32 %v4067_v59, %v710_v31  ;;  %v2190_v0 = vadd.f32 %v2189_v55, %v2188_v33  ;;  %v4581_v9 = vld [vmem:[#allocation80_spill] sm:$0xff] }
  0xfa   :  { %v262_v44 = vcombine.high %v4579_v58, %v4578_v49  ;;  %v2297_v5 = vadd.f32 %v2296_v50, %v2295_v47  ;;  %v2193_v39 = vsel %vm2007_vm0, %v1908_v20, 0.0  ;;  %v930_v40 = vrot.slane %v3996_v19, %v2609_v23  ;;  %v4582_v58 = vld [vmem:[#allocation82_spill] sm:$0xff] }
  0xfb   :  { %v1963_v42 = vmul.f32 %v4580_v8, %v922_v3  ;;  %v2300_v62 = vsel %vm2007_vm0, %v1961_v11, 0.0  ;;  %v2192_v7 = vadd.f32 %v2191_v35, %v2190_v0  ;;  %v2195_v12 = vsel %vm2007_vm0, %v1909_v37, 0.0  ;;  %v4583_v8 = vld [vmem:[#allocation81_spill] sm:$0xff] }
  0xfc   :  { %v2299_v28 = vadd.f32 %v2298_v41, %v2297_v5  ;;  %v934_v31 = vrot.slane %v3996_v19, %v2612_v24  ;;  %v1964_v48 = vmul.f32 %v4581_v9, %v926_v52  ;;  %v2302_v36 = vsel %vm2007_vm0, %v1962_v43, 0.0  ;;  %v4584_v9 = vld [vmem:[#allocation44_spill] sm:$0xff] }
  0xfd   :  { %v2194_v55 = vadd.f32 %v2193_v39, %v2192_v7  ;;  %v2197_v50 = vsel %vm2007_vm0, %v1910_v46, 0.0  ;;  %v938_v61 = vrot.slane %v262_v44, %v2587_v15  ;;  %v1965_v3 = vmul.f32 %v3369_v13, %v930_v40 }
  0xfe   :  { %v2301_v20 = vadd.f32 %v2300_v62, %v2299_v28  ;;  %v2304_v11 = vsel %vm2007_vm0, %v1963_v42, 0.0  ;;  %v942_v37 = vrot.slane %v262_v44, %v2590_v16  ;;  %v1966_v19 = vmul.f32 %v3413_v57, %v934_v31 }
  0xff   :  { %v2196_v33 = vadd.f32 %v2195_v12, %v2194_v55  ;;  %v2306_v35 = vsel %vm2007_vm0, %v1964_v48, 0.0  ;;  %v946_v41 = vrot.slane %v262_v44, %v2593_v17  ;;  %v1967_v46 = vmul.f32 %v3404_v26, %v938_v61  ;;  %v4585_v48 = vld [vmem:[#allocation43_spill] sm:$0xff] }
 0x100   :  { %v2303_v47 = vadd.f32 %v2302_v36, %v2301_v20  ;;  %v2308_v0 = vsel %vm2007_vm0, %v1965_v3, 0.0  ;;  %v950_v49 = vrot.slane %v262_v44, %v2596_v18  ;;  %v1968_v5 = vmul.f32 %v4582_v58, %v942_v37 }
 0x101   :  { %v2198_v52 = vadd.f32 %v2197_v50, %v2196_v33  ;;  %v2310_v39 = vsel %vm2007_vm0, %v1966_v19, 0.0  ;;  %v954_v57 = vrot.slane %v262_v44, %v2603_v21  ;;  %v1969_v42 = vmul.f32 %v4583_v8, %v946_v41 }
 0x102   :  { %v2305_v43 = vadd.f32 %v2304_v11, %v2303_v47  ;;  %v2312_v62 = vsel %vm2007_vm0, %v1967_v46, 0.0  ;;  %v958_v26 = vrot.slane %v262_v44, %v2606_v22  ;;  %v1970_v28 = vmul.f32 %v3492_v54, %v950_v49  ;;  %v4586_v11 = vld [vmem:[#allocation12_spill] sm:$0xff] }
 0x103   :  { %2199 = vadd.xlane.f32.xlu0 %v2198_v52  ;;  %v2314_v12 = vsel %vm2007_vm0, %v1968_v5, 0.0  ;;  %v278_v36 = vcombine.high %v4585_v48, %v4584_v9  ;;  %v962_v55 = vrot.slane %v262_v44, %v2609_v23  ;;  %v1971_v20 = vmul.f32 %v3433_v53, %v954_v57  ;;  %v4589_v9 = vld [vmem:[#allocation13_spill] sm:$0xff] }
 0x104   :  { %v2307_v13 = vadd.f32 %v2306_v35, %v2305_v43  ;;  %v2316_v50 = vsel %vm2007_vm0, %v1969_v42, 0.0  ;;  %v966_v3 = vrot.slane %v262_v44, %v2612_v24  ;;  %v1972_v33 = vmul.f32 %v4586_v11, %v958_v26 }
 0x105   :  { %v2318_v47 = vsel %vm2007_vm0, %v1970_v28, 0.0  ;;  %v970_v37 = vrot.slane %v278_v36, %v2587_v15  ;;  %v1973_v19 = vmul.f32 %v3449_v1, %v962_v55  ;;  %v2320_v35 = vsel %vm2007_vm0, %v1971_v20, 0.0  ;;  %v4587_v28 = vld [vmem:[#allocation46_spill] sm:$0xff] }
 0x106   :  { %v2309_v40 = vadd.f32 %v2308_v0, %v2307_v13  ;;  %v974_v43 = vrot.slane %v278_v36, %v2590_v16  ;;  %v1974_v53 = vmul.f32 %v3543_v32, %v966_v3  ;;  %v2322_v41 = vsel %vm2007_vm0, %v1972_v33, 0.0 }
 0x107   :  { %v2530_v44 = vmov 0   ;;  %v978_v0 = vrot.slane %v278_v36, %v2593_v17  ;;  %v1975_v13 = vmul.f32 %v3463_v60, %v970_v37  ;;  %v2324_v49 = vsel %vm2007_vm0, %v1973_v19, 0.0 }
 0x108   :  { %v2311_v7 = vadd.f32 %v2310_v39, %v2309_v40  ;;  %2452 = vset.pattern.permute.xlu1 %v2530_v44  ;;  %2453 = vset.pattern.permute.xlu0 %v2530_v44  ;;  %v982_v58 = vrot.slane %v278_v36, %v2596_v18  ;;  %v1976_v5 = vmul.f32 %v3556_v25, %v974_v43  ;;  %v2326_v39 = vsel %vm2007_vm0, %v1974_v53, 0.0  ;;  %v4591_v43 = vld [vmem:[#allocation15_spill] sm:$0xff] }
 0x109   :  { %v986_v40 = vrot.slane %v278_v36, %v2603_v21  ;;  %v1977_v57 = vmul.f32 %v3517_v34, %v978_v0  ;;  %v2328_v8 = vsel %vm2007_vm0, %v1975_v13, 0.0  ;;  %v998_v20 = vrot.slane %v278_v36, %v2612_v24 }
 0x10a   :  { %v2313_v31 = vadd.f32 %v2312_v62, %v2311_v7  ;;  %v990_v62 = vrot.slane %v278_v36, %v2606_v22  ;;  %v1978_v60 = vmul.f32 %v3608_v63, %v982_v58  ;;  %v2330_v7 = vsel %vm2007_vm0, %v1976_v5, 0.0 }
 0x10b   :  { %v1979_v48 = vmul.f32 %v4589_v9, %v986_v40  ;;  %v2332_v55 = vsel %vm2007_vm0, %v1977_v57, 0.0  ;;  %v1982_v19 = vmul.f32 %v3658_v6, %v998_v20  ;;  %v4593_v6 = vld [vmem:[#allocation14_spill] sm:$0xff]  ;;  %v4594_v40 = vld [vmem:[#allocation29_spill] sm:$0xff] }
 0x10c   :  { %v2315_v61 = vadd.f32 %v2314_v12, %v2313_v31  ;;  %v4588_v12 = vld [vmem:[#allocation45_spill] sm:$0xff]  ;;  %v994_v31 = vrot.slane %v278_v36, %v2609_v23  ;;  %v2334_v3 = vsel %vm2007_vm0, %v1978_v60, 0.0  ;;  %v4596_v60 = vld [vmem:[#allocation47_spill] sm:$0xff] }
 0x10d   :  { %v294_v25 = vcombine.high %v4588_v12, %v4587_v28  ;;  %v2342_v13 = vsel %vm2007_vm0, %v1982_v19, 0.0  ;;  %v4597_v28 = vld [vmem:[#allocation17_spill] sm:$0xff] }
 0x10e   :  { %v2317_v54 = vadd.f32 %v2316_v50, %v2315_v61  ;;  %v4590_v50 = vld [vmem:[#allocation16_spill] sm:$0xff]  ;;  %v1981_v33 = vmul.f32 %v3571_v27, %v994_v31  ;;  %v4592_v27 = vld [vmem:[#allocation18_spill] sm:$0xff] }
 0x10f   :  { %v1980_v61 = vmul.f32 %v4590_v50, %v990_v62  ;;  %v1002_v11 = vrot.slane %v294_v25, %v2587_v15  ;;  %v1006_v37 = vrot.slane %v294_v25, %v2590_v16  ;;  %v1010_v36 = vrot.slane %v294_v25, %v2593_v17  ;;  %v4595_v62 = vld [vmem:[#allocation48_spill] sm:$0xff] }
 0x110   :  { %v2319_v52 = vadd.f32 %v2318_v47, %v2317_v54  ;;  %v2336_v47 = vsel %vm2007_vm0, %v1979_v48, 0.0  ;;  %v1014_v44 = vrot.slane %v294_v25, %v2596_v18  ;;  %v1030_v48 = vrot.slane %v294_v25, %v2612_v24 }
 0x111   :  { %v1983_v53 = vmul.f32 %v4591_v43, %v1002_v11  ;;  %v1984_v0 = vmul.f32 %v4592_v27, %v1006_v37  ;;  %v1985_v58 = vmul.f32 %v4593_v6, %v1010_v36 }
 0x112   :  { %v2321_v46 = vadd.f32 %v2320_v35, %v2319_v52  ;;  %v2338_v35 = vsel %vm2007_vm0, %v1980_v61, 0.0  ;;  %v1986_v57 = vmul.f32 %v4594_v40, %v1014_v44  ;;  %v4604_v40 = vld [vmem:[#allocation50_spill] sm:$0xff] }
 0x113   :  { %v2344_v5 = vsel %vm2007_vm0, %v1983_v53, 0.0  ;;  %v2348_v31 = vsel %vm2007_vm0, %v1985_v58, 0.0  ;;  %v4603_v58 = vld [vmem:[#allocation35_spill] sm:$0xff] }
 0x114   :  { %v2323_v1 = vadd.f32 %v2322_v41, %v2321_v46  ;;  %v2340_v41 = vsel %vm2007_vm0, %v1981_v33, 0.0  ;;  %v2350_v20 = vsel %vm2007_vm0, %v1986_v57, 0.0  ;;  %v4605_v57 = vld [vmem:[#allocation49_spill] sm:$0xff] }
 0x116   :  { %v2325_v32 = vadd.f32 %v2324_v49, %v2323_v1  ;;  %v1018_v1 = vrot.slane %v294_v25, %v2603_v21 }
 0x118   :  { %v2327_v42 = vadd.f32 %v2326_v39, %v2325_v32  ;;  %v1022_v32 = vrot.slane %v294_v25, %v2606_v22  ;;  %v1987_v12 = vmul.f32 %v4597_v28, %v1018_v1 }
 0x11a   :  { %v2329_v26 = vadd.f32 %v2328_v8, %v2327_v42  ;;  %v2346_v8 = vsel %vm2007_vm0, %v1984_v0, 0.0  ;;  %v4602_v0 = vld [vmem:[#allocation25_spill] sm:$0xff] }
 0x11c   :  { %v2331_v34 = vadd.f32 %v2330_v7, %v2329_v26  ;;  %v310_v7 = vcombine.high %v4596_v60, %v4595_v62  ;;  %v1026_v26 = vrot.slane %v294_v25, %v2609_v23  ;;  %v4606_v62 = vld [vmem:[#allocation30_spill] sm:$0xff] }
 0x11e   :  { %v2333_v63 = vadd.f32 %v2332_v55, %v2331_v34  ;;  %v4598_v55 = vld [vmem:[#allocation26_spill] sm:$0xff]  ;;  %v1034_v61 = vrot.slane %v310_v7, %v2587_v15  ;;  %v1038_v33 = vrot.slane %v310_v7, %v2590_v16  ;;  %v1042_v25 = vrot.slane %v310_v7, %v2593_v17 }
 0x11f   :  { %v1988_v34 = vmul.f32 %v4598_v55, %v1022_v32  ;;  %v1046_v53 = vrot.slane %v310_v7, %v2596_v18  ;;  %v1050_v27 = vrot.slane %v310_v7, %v2603_v21  ;;  %v1054_v6 = vrot.slane %v310_v7, %v2606_v22 }
 0x120   :  { %v2335_v54 = vadd.f32 %v2334_v3, %v2333_v63  ;;  %v1989_v3 = vmul.f32 %v3732_v38, %v1026_v26  ;;  %v2352_v63 = vsel %vm2007_vm0, %v1987_v12, 0.0  ;;  %v4601_v38 = vld [vmem:[#allocation36_spill] sm:$0xff]  ;;  %v1062_v12 = vrot.slane %v310_v7, %v2612_v24 }
 0x121   :  { %v2354_v37 = vsel %vm2007_vm0, %v1988_v34, 0.0  ;;  %v1995_v60 = vmul.f32 %v4606_v62, %v1050_v27 }
 0x122   :  { %v2337_v52 = vadd.f32 %v2336_v47, %v2335_v54  ;;  %v4599_v47 = vld [vmem:[#allocation20_spill] sm:$0xff]  ;;  %v2356_v36 = vsel %vm2007_vm0, %v1989_v3, 0.0 }
 0x123   :  { %v1990_v54 = vmul.f32 %v4599_v47, %v1030_v48 }
 0x124   :  { %v2339_v46 = vadd.f32 %v2338_v35, %v2337_v52  ;;  %v4600_v35 = vld [vmem:[#allocation19_spill] sm:$0xff] }
 0x125   :  { %v1991_v52 = vmul.f32 %v4600_v35, %v1034_v61 }
 0x126   :  { %v2341_v49 = vadd.f32 %v2340_v41, %v2339_v46  ;;  %v1992_v41 = vmul.f32 %v4601_v38, %v1038_v33  ;;  %v2358_v46 = vsel %vm2007_vm0, %v1990_v54, 0.0 }
 0x128   :  { %v2343_v39 = vadd.f32 %v2342_v13, %v2341_v49  ;;  %v1993_v13 = vmul.f32 %v4602_v0, %v1042_v25  ;;  %v2360_v49 = vsel %vm2007_vm0, %v1991_v52, 0.0 }
 0x12a   :  { %v2345_v42 = vadd.f32 %v2344_v5, %v2343_v39  ;;  %v1994_v5 = vmul.f32 %v4603_v58, %v1046_v53  ;;  %v2362_v39 = vsel %vm2007_vm0, %v1992_v41, 0.0  ;;  %v2364_v26 = vsel %vm2007_vm0, %v1993_v13, 0.0 }
 0x12c   :  { %v2347_v9 = vadd.f32 %v2346_v8, %v2345_v42  ;;  %v326_v8 = vcombine.high %v4605_v57, %v4604_v40  ;;  %v1058_v42 = vrot.slane %v310_v7, %v2609_v23  ;;  %v2366_v48 = vsel %vm2007_vm0, %v1994_v5, 0.0 }
 0x12e   :  { %v2349_v50 = vadd.f32 %v2348_v31, %v2347_v9  ;;  %v4607_v31 = vld [vmem:[#allocation41_spill] sm:$0xff]  ;;  %v1066_v34 = vrot.slane %v326_v8, %v2587_v15  ;;  %v1070_v3 = vrot.slane %v326_v8, %v2590_v16  ;;  %v1074_v7 = vrot.slane %v326_v8, %v2593_v17 }
 0x12f   :  { %v1996_v9 = vmul.f32 %v4607_v31, %v1054_v6  ;;  %v1078_v15 = vrot.slane %v326_v8, %v2596_v18  ;;  %v1082_v16 = vrot.slane %v326_v8, %v2603_v21  ;;  %v1086_v17 = vrot.slane %v326_v8, %v2606_v22 }
 0x130   :  { %v2351_v11 = vadd.f32 %v2350_v20, %v2349_v50  ;;  %v1997_v20 = vmul.f32 %v3864_v14, %v1058_v42  ;;  %v2368_v50 = vsel %vm2007_vm0, %v1995_v60, 0.0  ;;  %v1999_v47 = vmul.f32 %v3930_v29, %v1066_v34 }
 0x131   :  { %v2000_v14 = vmul.f32 %v3979_v45, %v1070_v3  ;;  %v2002_v29 = vmul.f32 %v4018_v4, %v1078_v15  ;;  %v1090_v18 = vrot.slane %v326_v8, %v2609_v23  ;;  %v2003_v45 = vmul.f32 %v4005_v10, %v1082_v16 }
 0x132   :  { %v2353_v19 = vadd.f32 %v2352_v63, %v2351_v11  ;;  %v1998_v63 = vmul.f32 %v3954_v56, %v1062_v12  ;;  %v2370_v11 = vsel %vm2007_vm0, %v1996_v9, 0.0  ;;  %v2372_v54 = vsel %vm2007_vm0, %v1997_v20, 0.0 }
 0x133   :  { %v2001_v56 = vmul.f32 %v3966_v2, %v1074_v7  ;;  %v2376_v35 = vsel %vm2007_vm0, %v1999_v47, 0.0  ;;  %v1094_v21 = vrot.slane %v326_v8, %v2612_v24  ;;  %v2004_v2 = vmul.f32 %v4043_v30, %v1086_v17 }
 0x134   :  { %v2355_v43 = vadd.f32 %v2354_v37, %v2353_v19  ;;  %v2374_v19 = vsel %vm2007_vm0, %v1998_v63, 0.0  ;;  %v2382_v41 = vsel %vm2007_vm0, %v2002_v29, 0.0  ;;  %v2005_v22 = vmul.f32 %v4030_v51, %v1090_v18 }
 0x135   :  { %v2380_v53 = vsel %vm2007_vm0, %v2001_v56, 0.0  ;;  %v2384_v4 = vsel %vm2007_vm0, %v2003_v45, 0.0  ;;  %v2006_v27 = vmul.f32 %v4067_v59, %v1094_v21  ;;  %v2386_v23 = vsel %vm2007_vm0, %v2004_v2, 0.0 }
 0x136   :  { %v2357_v44 = vadd.f32 %v2356_v36, %v2355_v43  ;;  %v2378_v36 = vsel %vm2007_vm0, %v2000_v14, 0.0  ;;  %v2388_v0 = vsel %vm2007_vm0, %v2005_v22, 0.0 }
 0x137   :  { %v2390_v24 = vsel %vm2007_vm0, %v2006_v27, 0.0 }
 0x138   :  { %v2359_v1 = vadd.f32 %v2358_v46, %v2357_v44 }
 0x13a   :  { %v2361_v32 = vadd.f32 %v2360_v49, %v2359_v1 }
 0x13c   :  { %v2363_v28 = vadd.f32 %v2362_v39, %v2361_v32  ;;  %v4608_v39 = vlaneseq  ;;  %v4609_v32 = vld [vmem:[#allocation11_spill] sm:$0xff] }
 0x13e   :  { %v2365_v55 = vadd.f32 %v2364_v26, %v2363_v28  ;;  %v2415_v59 = vand.u32 127, %v4608_v39 }
 0x140   :  { %v2367_v61 = vadd.f32 %v2366_v48, %v2365_v55  ;;  %v2418_v40 = vsub.s32 %v2415_v59, %v4609_v32 }
 0x142   :  { %v2369_v33 = vadd.f32 %v2368_v50, %v2367_v61 }
 0x144   :  { %v2371_v37 = vadd.f32 %v2370_v11, %v2369_v33 }
 0x146   :  { %v2373_v25 = vadd.f32 %v2372_v54, %v2371_v37 }
 0x147   :  { %v2402_v1 = vpop.permute.xlu1 %2401 }
 0x148   :  { %v2375_v52 = vadd.f32 %v2374_v19, %v2373_v25 }
 0x14a   :  { %v2377_v43 = vadd.f32 %v2376_v35, %v2375_v52 }
 0x14c   :  { %v2379_v38 = vadd.f32 %v2378_v36, %v2377_v43 }
 0x14e   :  { %v2381_v46 = vadd.f32 %v2380_v53, %v2379_v38 }
 0x150   :  { %v2383_v44 = vadd.f32 %v2382_v41, %v2381_v46 }
 0x152   :  { %v2385_v10 = vadd.f32 %v2384_v4, %v2383_v44 }
 0x154   :  { %v2387_v13 = vadd.f32 %v2386_v23, %v2385_v10 }
 0x156   :  { %v2389_v49 = vadd.f32 %v2388_v0, %v2387_v13 }
 0x158   :  { %v2391_v30 = vadd.f32 %v2390_v24, %v2389_v49 }
 0x15a   :  { %2392 = vadd.xlane.f32.xlu0 %v2391_v30 }
 0x190   :  { %v2200_v6 = vpop.xlane.xlu0 %2199 }
 0x191   :  { %v2404_v58 = vadd.f32 %v2402_v1, %v2200_v6 }
 0x193   :  { %2409 = vperm.xlu1 %2452, %v2404_v58  }
 0x1e7   :  { %v2393_v51 = vpop.xlane.xlu0 %2392 }
 0x1e8   :  { %v2405_v5 = vadd.f32 %v2402_v1, %v2393_v51 }
 0x1ea   :  { %2412 = vperm.xlu0 %2453, %v2405_v5  }
 0x212   :  { %v2410_v57 = vpop.permute.xlu1 %2409 }
 0x213   :  { %v2419_v42 = vrot.slane %v2410_v57, %v2418_v40 }
 0x269   :  { %v2413_v8 = vpop.permute.xlu0 %2412 }
 0x26a   :  { %v2423_v62 = vrot.slane %v2413_v8, %v2418_v40 }
 0x26c   :  { %v2425_v60 = vsel %vm2424_vm1, %v2423_v62, %v2419_v42 }
 0x26d   :  { %2428 = vst.msk [vmem:[#allocation7] sm:$0x3] %vm2427_vm2, %v2425_v60 }
 0x26e   :  { %2509 = shalt.err (!%p2506_p6)
}
 0x26f   :  { %s2510_s13 = scalar_lea.hbm %s4252_s3, 32 }
 0x270   :  { %p2511_p7 = scmp.ne.s32.totalorder %s4252_s3, %s2510_s13  ;;  %p2514_p8 = scmp.lt.u32.totalorder %s2510_s13, %s4252_s3 }
 0x272   :  { %p2516_p9 = pnand %p2514_p8, %p2511_p7 }
 0x274   :  { %2519 = shalt.err (!%p2516_p9)
}
 0x275   :  { %2438 = dma.vmem_to_hbm [thread:$0]  %s2436_s9, 32, %s4252_s3, [#allocation4]  }
 0x276   :  { %2524 = dma.done.wait [#allocation4], 32  }
 0x277   :  { %2525 = vsyncadd [#allocation4], 4294967264 }
 0x278   :  { %2442 = vsyncpa [#allocation3], 1 }
 0x279   :  { %2443 = vsyncpa [#allocation6], 1 }
 0x27a   :  { %2444 = vsyncpa [#allocation4], 1 }

</bundles_post_ra>
